<compile_context>
chip_gen: v7x
topology: tpu7x:2x2x1
jax: 0.10.0
libtpu: 0.0.40
codegen_flags: <defaults>
</compile_context>

<pallas_src>
import jax
import jax.numpy as jnp
from jax.experimental import pallas as pl
from jax.experimental.pallas import tpu as pltpu


# ----------------------------- Pallas kernel --------------------------------

def _disc_kernel(x_ref, k1_ref, cb1_ref, p1_ref, k2_ref, cb2_ref, p2_ref,
                 k3_ref, cb3_ref, p3_ref, fw1_ref, fb1_ref, fw2_ref, fb2_ref,
                 fw3_ref, fb3_ref, fw4_ref, fb4_ref, out_ref):
    f32 = jnp.float32
    bt = x_ref.shape[0]

    def conv_relu_pool(h, k_ref, b_ref, p_ref):
        # conv (zero padding + all taps + channel mix folded into k) + bias + ReLU
        y = jnp.dot(h, k_ref[...], preferred_element_type=f32) + b_ref[...]
        y = jnp.maximum(y, 0.0)
        # max-pool(2,2): pairwise max with next lane, then precomputed even-lane gather.
        # (the shifted value at an odd lane / channel boundary is never selected by p_ref)
        y_next = jnp.concatenate([y[:, 1:], jnp.zeros((bt, 1), f32)], axis=1)
        return jnp.dot(jnp.maximum(y, y_next), p_ref[...], preferred_element_type=f32)

    h = x_ref[...]                                    # (BT, L)
    h = conv_relu_pool(h, k1_ref, cb1_ref, p1_ref)    # (BT, 4*L/2)
    h = conv_relu_pool(h, k2_ref, cb2_ref, p2_ref)    # (BT, 8*L/4)
    h = conv_relu_pool(h, k3_ref, cb3_ref, p3_ref)    # (BT, 16*L/8)  lanes = c*Lf + l

    # flatten is a no-op (lane order already matches PyTorch's x.view(B, -1))
    z = jnp.maximum(jnp.dot(h, fw1_ref[...], preferred_element_type=f32) + fb1_ref[...], 0.0)
    z = jnp.maximum(jnp.dot(z, fw2_ref[...], preferred_element_type=f32) + fb2_ref[...], 0.0)
    z = jnp.maximum(jnp.dot(z, fw3_ref[...], preferred_element_type=f32) + fb3_ref[...], 0.0)
    z = jnp.dot(z, fw4_ref[...], preferred_element_type=f32) + fb4_ref[...]
    out_ref[...] = 1.0 / (1.0 + jnp.exp(-z))          # sigmoid, one store per tile


# --------------------- wrapper-side operator precompute ----------------------

def _conv_to_dense(w, length):
    """w: (Cout, Cin, 3) -> K: (Cin*length, Cout*length) with zero padding folded in.

    K[i*length + p, c*length + m] = w[c, i, p - m + 1] if 0 <= p - m + 1 < 3 else 0
    (built with gathers/compares only; no matmuls, so it is precision-exact)."""
    cout, cin, kw = w.shape
    p = jnp.arange(length)
    m = jnp.arange(length)
    kidx = p[:, None] - m[None, :] + 1                       # (L, L)
    valid = (kidx >= 0) & (kidx < kw)
    wt = w[:, :, jnp.clip(kidx, 0, kw - 1)]                  # (Cout, Cin, L, L)
    wt = jnp.where(valid[None, None, :, :], wt, 0.0)
    return jnp.transpose(wt, (1, 2, 0, 3)).reshape(cin * length, cout * length)


def _pool_matrix(channels, length):
    """Even-lane gather for MaxPool1d(2,2): (channels*length, channels*length//2)."""
    half = length // 2
    src = jnp.arange(channels * length)
    dst = jnp.arange(channels * half)
    same_c = (src[:, None] // length) == (dst[None, :] // half)
    even = (src[:, None] % length) == 2 * (dst[None, :] % half)
    return (same_c & even).astype(jnp.float32)


# ------------------------------ forward wrapper -------------------------------

def discriminator_forward(x, params, *, batch_tile=8):
    """x: (B, 1, L) float32 -> (B, 1) float32."""
    b_total, cin0, l0 = x.shape
    assert cin0 == 1 and l0 % 8 == 0
    x2d = x.reshape(b_total, l0)
    l1, l2 = l0 // 2, l0 // 4

    k1 = _conv_to_dense(params['w1'], l0)
    k2 = _conv_to_dense(params['w2'], l1)
    k3 = _conv_to_dense(params['w3'], l2)
    cb1 = jnp.repeat(params['b1'], l0)[None, :]
    cb2 = jnp.repeat(params['b2'], l1)[None, :]
    cb3 = jnp.repeat(params['b3'], l2)[None, :]
    p1 = _pool_matrix(4, l0)
    p2 = _pool_matrix(8, l1)
    p3 = _pool_matrix(16, l2)
    fw1, fb1 = params['W1'].T, params['B1'][None, :]
    fw2, fb2 = params['W2'].T, params['B2'][None, :]
    fw3, fb3 = params['W3'].T, params['B3'][None, :]
    fw4, fb4 = params['W4'].T, params['B4'][None, :]

    consts = (k1, cb1, p1, k2, cb2, p2, k3, cb3, p3,
              fw1, fb1, fw2, fb2, fw3, fb3, fw4, fb4)

    # Batch tile: multiple of 8 sublanes when possible, otherwise the full batch.
    if b_total % batch_tile == 0 and batch_tile % 8 == 0:
        bt = batch_tile
    else:
        bt = b_total
    grid = (b_total // bt,)

    in_specs = ([pl.BlockSpec((bt, l0), lambda i: (i, 0))]
                + [pl.BlockSpec(c.shape, lambda i: (0, 0)) for c in consts])
    out_specs = pl.BlockSpec((bt, 1), lambda i: (i, 0))

    return pl.pallas_call(
        _disc_kernel,
        out_shape=jax.ShapeDtypeStruct((b_total, 1), jnp.float32),
        grid=grid,
        in_specs=in_specs,
        out_specs=out_specs,
        compiler_params=pltpu.CompilerParams(dimension_semantics=("parallel",)),
    )(x2d, *consts)


# --------------------- deterministic parameter init --------------------------

def make_discriminator_params(key, input_size):
    final_length = input_size
    for _ in range(3):
        final_length = (final_length + 2 - 3) // 1 + 1
        final_length //= 2

    def uinit(k, shape, fan_in):
        bound = 1.0 / (fan_in ** 0.5)
        return jax.random.uniform(k, shape, jnp.float32, -bound, bound)

    ks = jax.random.split(key, 14)
    params = {
        'w1': uinit(ks[0], (4, 1, 3), 1 * 3),   'b1': uinit(ks[1], (4,), 1 * 3),
        'w2': uinit(ks[2], (8, 4, 3), 4 * 3),   'b2': uinit(ks[3], (8,), 4 * 3),
        'w3': uinit(ks[4], (16, 8, 3), 8 * 3),  'b3': uinit(ks[5], (16,), 8 * 3),
        'W1': uinit(ks[6], (256, 16 * final_length), 16 * final_length),
        'B1': uinit(ks[7], (256,), 16 * final_length),
        'W2': uinit(ks[8], (64, 256), 256),     'B2': uinit(ks[9], (64,), 256),
        'W3': uinit(ks[10], (16, 64), 64),      'B3': uinit(ks[11], (16,), 64),
        'W4': uinit(ks[12], (1, 16), 16),       'B4': uinit(ks[13], (1,), 16),
    }
    return params, final_length


# ------------------------- pure-JAX reference --------------------------------

def reference_forward(x, params):
    hp = jax.lax.Precision.HIGHEST
    h = x
    for w, b in ((params['w1'], params['b1']),
                 (params['w2'], params['b2']),
                 (params['w3'], params['b3'])):
        h = jax.lax.conv_general_dilated(
            h, w, window_strides=(1,), padding=((1, 1),),
            dimension_numbers=('NCH', 'OIH', 'NCH'), precision=hp)
        h = jnp.maximum(h + b[None, :, None], 0.0)
        bb, cc, ll = h.shape
        h = jnp.max(h.reshape(bb, cc, ll // 2, 2), axis=-1)
    z = h.reshape(h.shape[0], -1)
    z = jnp.maximum(jnp.dot(z, params['W1'].T, precision=hp) + params['B1'], 0.0)
    z = jnp.maximum(jnp.dot(z, params['W2'].T, precision=hp) + params['B2'], 0.0)
    z = jnp.maximum(jnp.dot(z, params['W3'].T, precision=hp) + params['B3'], 0.0)
    z = jnp.dot(z, params['W4'].T, precision=hp) + params['B4']
    return jax.nn.sigmoid(z)


# --------------------------------- main ---------------------------------------

if __name__ == "__main__":
    input_size = 64
    batch = 16          # two batch tiles of 8 -> exercises the parallel grid

    key = jax.random.PRNGKey(0)
    kx, kp = jax.random.split(key)
    x = jax.random.normal(kx, (batch, 1, input_size), jnp.float32)
    params, final_length = make_discriminator_params(kp, input_size)

    out = jax.block_until_ready(discriminator_forward(x, params))
    ref = jax.block_until_ready(reference_forward(x, params))

    assert out.shape == (batch, 1), out.shape
    assert jnp.allclose(out, ref, atol=1e-5, rtol=1e-5), (out, ref)

    print("KERNEL_OK")
</pallas_src>

<mosaic_0001>
module attributes {stable_mosaic.version = 11 : i64} {
  func.func @_disc_kernel(%arg0: i32, %arg1: memref<8x64xf32, #tpu.memory_space<vmem>>, %arg2: memref<64x256xf32, #tpu.memory_space<vmem>>, %arg3: memref<1x256xf32, #tpu.memory_space<vmem>>, %arg4: memref<256x128xf32, #tpu.memory_space<vmem>>, %arg5: memref<128x256xf32, #tpu.memory_space<vmem>>, %arg6: memref<1x256xf32, #tpu.memory_space<vmem>>, %arg7: memref<256x128xf32, #tpu.memory_space<vmem>>, %arg8: memref<128x256xf32, #tpu.memory_space<vmem>>, %arg9: memref<1x256xf32, #tpu.memory_space<vmem>>, %arg10: memref<256x128xf32, #tpu.memory_space<vmem>>, %arg11: memref<128x256xf32, #tpu.memory_space<vmem>>, %arg12: memref<1x256xf32, #tpu.memory_space<vmem>>, %arg13: memref<256x64xf32, #tpu.memory_space<vmem>>, %arg14: memref<1x64xf32, #tpu.memory_space<vmem>>, %arg15: memref<64x16xf32, #tpu.memory_space<vmem>>, %arg16: memref<1x16xf32, #tpu.memory_space<vmem>>, %arg17: memref<16x1xf32, #tpu.memory_space<vmem>>, %arg18: memref<1x1xf32, #tpu.memory_space<vmem>>, %arg19: memref<8x1xf32, #tpu.memory_space<vmem>>) attributes {dimension_semantics = [#tpu.dimension_semantics<parallel>], iteration_bounds = array<i64: 2>, scalar_prefetch = 0 : i64, scratch_operands = 0 : i64, tpu.core_type = #tpu.core_type<tc>, window_params = [{transform_indices = @transform_0, window_bounds = array<i64: 8, 64>}, {pipeline_mode = #tpu.pipeline_mode<synchronous>, transform_indices = @transform_1, window_bounds = array<i64: 64, 256>}, {pipeline_mode = #tpu.pipeline_mode<synchronous>, transform_indices = @transform_2, window_bounds = array<i64: 1, 256>}, {pipeline_mode = #tpu.pipeline_mode<synchronous>, transform_indices = @transform_3, window_bounds = array<i64: 256, 128>}, {pipeline_mode = #tpu.pipeline_mode<synchronous>, transform_indices = @transform_4, window_bounds = array<i64: 128, 256>}, {pipeline_mode = #tpu.pipeline_mode<synchronous>, transform_indices = @transform_5, window_bounds = array<i64: 1, 256>}, {pipeline_mode = #tpu.pipeline_mode<synchronous>, transform_indices = @transform_6, window_bounds = array<i64: 256, 128>}, {pipeline_mode = #tpu.pipeline_mode<synchronous>, transform_indices = @transform_7, window_bounds = array<i64: 128, 256>}, {pipeline_mode = #tpu.pipeline_mode<synchronous>, transform_indices = @transform_8, window_bounds = array<i64: 1, 256>}, {pipeline_mode = #tpu.pipeline_mode<synchronous>, transform_indices = @transform_9, window_bounds = array<i64: 256, 128>}, {pipeline_mode = #tpu.pipeline_mode<synchronous>, transform_indices = @transform_10, window_bounds = array<i64: 128, 256>}, {pipeline_mode = #tpu.pipeline_mode<synchronous>, transform_indices = @transform_11, window_bounds = array<i64: 1, 256>}, {pipeline_mode = #tpu.pipeline_mode<synchronous>, transform_indices = @transform_12, window_bounds = array<i64: 256, 64>}, {pipeline_mode = #tpu.pipeline_mode<synchronous>, transform_indices = @transform_13, window_bounds = array<i64: 1, 64>}, {pipeline_mode = #tpu.pipeline_mode<synchronous>, transform_indices = @transform_14, window_bounds = array<i64: 64, 16>}, {pipeline_mode = #tpu.pipeline_mode<synchronous>, transform_indices = @transform_15, window_bounds = array<i64: 1, 16>}, {pipeline_mode = #tpu.pipeline_mode<synchronous>, transform_indices = @transform_16, window_bounds = array<i64: 16, 1>}, {pipeline_mode = #tpu.pipeline_mode<synchronous>, transform_indices = @transform_17, window_bounds = array<i64: 1, 1>}, {transform_indices = @transform_18, window_bounds = array<i64: 8, 1>}]} {
    %c0 = arith.constant 0 : index
    %c0_0 = arith.constant 0 : index
    %0 = vector.load %arg1[%c0, %c0_0] : memref<8x64xf32, #tpu.memory_space<vmem>>, vector<8x64xf32>
    %c0_1 = arith.constant 0 : index
    %c0_2 = arith.constant 0 : index
    %1 = vector.load %arg2[%c0_1, %c0_2] : memref<64x256xf32, #tpu.memory_space<vmem>>, vector<64x256xf32>
    %cst = arith.constant dense<0.000000e+00> : vector<8x256xf32>
    %2 = tpu.matmul %0, %1, %cst {dimension_numbers = #tpu.dot_dimension_numbers<[1], [0], [0], [1], [0, 0, 1, 1], [], []>} : vector<8x64xf32>, vector<64x256xf32>, vector<8x256xf32> -> vector<8x256xf32>
    %c0_3 = arith.constant 0 : index
    %c0_4 = arith.constant 0 : index
    %3 = vector.load %arg3[%c0_3, %c0_4] : memref<1x256xf32, #tpu.memory_space<vmem>>, vector<1x256xf32>
    %4 = vector.broadcast %3 : vector<1x256xf32> to vector<8x256xf32>
    %5 = arith.addf %2, %4 : vector<8x256xf32>
    %cst_5 = arith.constant 0.000000e+00 : f32
    %6 = vector.broadcast %cst_5 : f32 to vector<8x256xf32>
    %7 = arith.maximumf %5, %6 : vector<8x256xf32>
    %8 = vector.extract_strided_slice %7 {offsets = [0, 1], sizes = [8, 255], strides = [1, 1]} : vector<8x256xf32> to vector<8x255xf32>
    %cst_6 = arith.constant 0.000000e+00 : f32
    %9 = vector.broadcast %cst_6 : f32 to vector<8x1xf32>
    %10 = tpu.concatenate %8, %9 in 1 : vector<8x255xf32>, vector<8x1xf32> -> vector<8x256xf32>
    %11 = arith.maximumf %7, %10 : vector<8x256xf32>
    %c0_7 = arith.constant 0 : index
    %c0_8 = arith.constant 0 : index
    %12 = vector.load %arg4[%c0_7, %c0_8] : memref<256x128xf32, #tpu.memory_space<vmem>>, vector<256x128xf32>
    %cst_9 = arith.constant dense<0.000000e+00> : vector<8x128xf32>
    %13 = tpu.matmul %11, %12, %cst_9 {dimension_numbers = #tpu.dot_dimension_numbers<[1], [0], [0], [1], [0, 0, 1, 1], [], []>} : vector<8x256xf32>, vector<256x128xf32>, vector<8x128xf32> -> vector<8x128xf32>
    %c0_10 = arith.constant 0 : index
    %c0_11 = arith.constant 0 : index
    %14 = vector.load %arg5[%c0_10, %c0_11] : memref<128x256xf32, #tpu.memory_space<vmem>>, vector<128x256xf32>
    %cst_12 = arith.constant dense<0.000000e+00> : vector<8x256xf32>
    %15 = tpu.matmul %13, %14, %cst_12 {dimension_numbers = #tpu.dot_dimension_numbers<[1], [0], [0], [1], [0, 0, 1, 1], [], []>} : vector<8x128xf32>, vector<128x256xf32>, vector<8x256xf32> -> vector<8x256xf32>
    %c0_13 = arith.constant 0 : index
    %c0_14 = arith.constant 0 : index
    %16 = vector.load %arg6[%c0_13, %c0_14] : memref<1x256xf32, #tpu.memory_space<vmem>>, vector<1x256xf32>
    %17 = vector.broadcast %16 : vector<1x256xf32> to vector<8x256xf32>
    %18 = arith.addf %15, %17 : vector<8x256xf32>
    %cst_15 = arith.constant 0.000000e+00 : f32
    %19 = vector.broadcast %cst_15 : f32 to vector<8x256xf32>
    %20 = arith.maximumf %18, %19 : vector<8x256xf32>
    %21 = vector.extract_strided_slice %20 {offsets = [0, 1], sizes = [8, 255], strides = [1, 1]} : vector<8x256xf32> to vector<8x255xf32>
    %cst_16 = arith.constant 0.000000e+00 : f32
    %22 = vector.broadcast %cst_16 : f32 to vector<8x1xf32>
    %23 = tpu.concatenate %21, %22 in 1 : vector<8x255xf32>, vector<8x1xf32> -> vector<8x256xf32>
    %24 = arith.maximumf %20, %23 : vector<8x256xf32>
    %c0_17 = arith.constant 0 : index
    %c0_18 = arith.constant 0 : index
    %25 = vector.load %arg7[%c0_17, %c0_18] : memref<256x128xf32, #tpu.memory_space<vmem>>, vector<256x128xf32>
    %cst_19 = arith.constant dense<0.000000e+00> : vector<8x128xf32>
    %26 = tpu.matmul %24, %25, %cst_19 {dimension_numbers = #tpu.dot_dimension_numbers<[1], [0], [0], [1], [0, 0, 1, 1], [], []>} : vector<8x256xf32>, vector<256x128xf32>, vector<8x128xf32> -> vector<8x128xf32>
    %c0_20 = arith.constant 0 : index
    %c0_21 = arith.constant 0 : index
    %27 = vector.load %arg8[%c0_20, %c0_21] : memref<128x256xf32, #tpu.memory_space<vmem>>, vector<128x256xf32>
    %cst_22 = arith.constant dense<0.000000e+00> : vector<8x256xf32>
    %28 = tpu.matmul %26, %27, %cst_22 {dimension_numbers = #tpu.dot_dimension_numbers<[1], [0], [0], [1], [0, 0, 1, 1], [], []>} : vector<8x128xf32>, vector<128x256xf32>, vector<8x256xf32> -> vector<8x256xf32>
    %c0_23 = arith.constant 0 : index
    %c0_24 = arith.constant 0 : index
    %29 = vector.load %arg9[%c0_23, %c0_24] : memref<1x256xf32, #tpu.memory_space<vmem>>, vector<1x256xf32>
    %30 = vector.broadcast %29 : vector<1x256xf32> to vector<8x256xf32>
    %31 = arith.addf %28, %30 : vector<8x256xf32>
    %cst_25 = arith.constant 0.000000e+00 : f32
    %32 = vector.broadcast %cst_25 : f32 to vector<8x256xf32>
    %33 = arith.maximumf %31, %32 : vector<8x256xf32>
    %34 = vector.extract_strided_slice %33 {offsets = [0, 1], sizes = [8, 255], strides = [1, 1]} : vector<8x256xf32> to vector<8x255xf32>
    %cst_26 = arith.constant 0.000000e+00 : f32
    %35 = vector.broadcast %cst_26 : f32 to vector<8x1xf32>
    %36 = tpu.concatenate %34, %35 in 1 : vector<8x255xf32>, vector<8x1xf32> -> vector<8x256xf32>
    %37 = arith.maximumf %33, %36 : vector<8x256xf32>
    %c0_27 = arith.constant 0 : index
    %c0_28 = arith.constant 0 : index
    %38 = vector.load %arg10[%c0_27, %c0_28] : memref<256x128xf32, #tpu.memory_space<vmem>>, vector<256x128xf32>
    %cst_29 = arith.constant dense<0.000000e+00> : vector<8x128xf32>
    %39 = tpu.matmul %37, %38, %cst_29 {dimension_numbers = #tpu.dot_dimension_numbers<[1], [0], [0], [1], [0, 0, 1, 1], [], []>} : vector<8x256xf32>, vector<256x128xf32>, vector<8x128xf32> -> vector<8x128xf32>
    %c0_30 = arith.constant 0 : index
    %c0_31 = arith.constant 0 : index
    %40 = vector.load %arg11[%c0_30, %c0_31] : memref<128x256xf32, #tpu.memory_space<vmem>>, vector<128x256xf32>
    %cst_32 = arith.constant dense<0.000000e+00> : vector<8x256xf32>
    %41 = tpu.matmul %39, %40, %cst_32 {dimension_numbers = #tpu.dot_dimension_numbers<[1], [0], [0], [1], [0, 0, 1, 1], [], []>} : vector<8x128xf32>, vector<128x256xf32>, vector<8x256xf32> -> vector<8x256xf32>
    %c0_33 = arith.constant 0 : index
    %c0_34 = arith.constant 0 : index
    %42 = vector.load %arg12[%c0_33, %c0_34] : memref<1x256xf32, #tpu.memory_space<vmem>>, vector<1x256xf32>
    %43 = vector.broadcast %42 : vector<1x256xf32> to vector<8x256xf32>
    %44 = arith.addf %41, %43 : vector<8x256xf32>
    %cst_35 = arith.constant 0.000000e+00 : f32
    %45 = vector.broadcast %cst_35 : f32 to vector<8x256xf32>
    %46 = arith.maximumf %44, %45 : vector<8x256xf32>
    %c0_36 = arith.constant 0 : index
    %c0_37 = arith.constant 0 : index
    %47 = vector.load %arg13[%c0_36, %c0_37] : memref<256x64xf32, #tpu.memory_space<vmem>>, vector<256x64xf32>
    %cst_38 = arith.constant dense<0.000000e+00> : vector<8x64xf32>
    %48 = tpu.matmul %46, %47, %cst_38 {dimension_numbers = #tpu.dot_dimension_numbers<[1], [0], [0], [1], [0, 0, 1, 1], [], []>} : vector<8x256xf32>, vector<256x64xf32>, vector<8x64xf32> -> vector<8x64xf32>
    %c0_39 = arith.constant 0 : index
    %c0_40 = arith.constant 0 : index
    %49 = vector.load %arg14[%c0_39, %c0_40] : memref<1x64xf32, #tpu.memory_space<vmem>>, vector<1x64xf32>
    %50 = vector.broadcast %49 : vector<1x64xf32> to vector<8x64xf32>
    %51 = arith.addf %48, %50 : vector<8x64xf32>
    %cst_41 = arith.constant 0.000000e+00 : f32
    %52 = vector.broadcast %cst_41 : f32 to vector<8x64xf32>
    %53 = arith.maximumf %51, %52 : vector<8x64xf32>
    %c0_42 = arith.constant 0 : index
    %c0_43 = arith.constant 0 : index
    %54 = vector.load %arg15[%c0_42, %c0_43] : memref<64x16xf32, #tpu.memory_space<vmem>>, vector<64x16xf32>
    %cst_44 = arith.constant dense<0.000000e+00> : vector<8x16xf32>
    %55 = tpu.matmul %53, %54, %cst_44 {dimension_numbers = #tpu.dot_dimension_numbers<[1], [0], [0], [1], [0, 0, 1, 1], [], []>} : vector<8x64xf32>, vector<64x16xf32>, vector<8x16xf32> -> vector<8x16xf32>
    %c0_45 = arith.constant 0 : index
    %c0_46 = arith.constant 0 : index
    %56 = vector.load %arg16[%c0_45, %c0_46] : memref<1x16xf32, #tpu.memory_space<vmem>>, vector<1x16xf32>
    %57 = vector.broadcast %56 : vector<1x16xf32> to vector<8x16xf32>
    %58 = arith.addf %55, %57 : vector<8x16xf32>
    %cst_47 = arith.constant 0.000000e+00 : f32
    %59 = vector.broadcast %cst_47 : f32 to vector<8x16xf32>
    %60 = arith.maximumf %58, %59 : vector<8x16xf32>
    %c0_48 = arith.constant 0 : index
    %c0_49 = arith.constant 0 : index
    %61 = vector.load %arg17[%c0_48, %c0_49] : memref<16x1xf32, #tpu.memory_space<vmem>>, vector<16x1xf32>
    %cst_50 = arith.constant dense<0.000000e+00> : vector<8x1xf32>
    %62 = tpu.matmul %60, %61, %cst_50 {dimension_numbers = #tpu.dot_dimension_numbers<[1], [0], [0], [1], [0, 0, 1, 1], [], []>} : vector<8x16xf32>, vector<16x1xf32>, vector<8x1xf32> -> vector<8x1xf32>
    %c0_51 = arith.constant 0 : index
    %c0_52 = arith.constant 0 : index
    %63 = vector.load %arg18[%c0_51, %c0_52] : memref<1x1xf32, #tpu.memory_space<vmem>>, vector<1x1xf32>
    %64 = vector.broadcast %63 : vector<1x1xf32> to vector<8x1xf32>
    %65 = arith.addf %62, %64 : vector<8x1xf32>
    %cst_53 = arith.constant 0.000000e+00 : f32
    %66 = vector.broadcast %cst_53 : f32 to vector<8x1xf32>
    %67 = arith.subf %66, %65 : vector<8x1xf32>
    %68 = math.exp %67 : vector<8x1xf32>
    %cst_54 = arith.constant 1.000000e+00 : f32
    %69 = vector.broadcast %cst_54 : f32 to vector<8x1xf32>
    %70 = arith.addf %69, %68 : vector<8x1xf32>
    %cst_55 = arith.constant 1.000000e+00 : f32
    %71 = vector.broadcast %cst_55 : f32 to vector<8x1xf32>
    %72 = arith.divf %71, %70 : vector<8x1xf32>
    %c0_56 = arith.constant 0 : index
    %c0_57 = arith.constant 0 : index
    %73 = vector.load %arg19[%c0_56, %c0_57] : memref<8x1xf32, #tpu.memory_space<vmem>>, vector<8x1xf32>
    tpu.vector_store %arg19[%c0_56, %c0_57], %72 {strides = array<i32>} : memref<8x1xf32, #tpu.memory_space<vmem>>, vector<8x1xf32>,
    return
  }
  func.func @transform_0(%arg0: i32) -> (i32, i32) {
    %c0_i32 = arith.constant 0 : i32
    %c0_i32_0 = arith.constant 0 : i32
    return %arg0, %c0_i32 : i32, i32
  }
  func.func @transform_1(%arg0: i32) -> (i32, i32) {
    %c0_i32 = arith.constant 0 : i32
    %c0_i32_0 = arith.constant 0 : i32
    %c0_i32_1 = arith.constant 0 : i32
    return %c0_i32, %c0_i32_0 : i32, i32
  }
  func.func @transform_2(%arg0: i32) -> (i32, i32) {
    %c0_i32 = arith.constant 0 : i32
    %c0_i32_0 = arith.constant 0 : i32
    %c0_i32_1 = arith.constant 0 : i32
    return %c0_i32, %c0_i32_0 : i32, i32
  }
  func.func @transform_3(%arg0: i32) -> (i32, i32) {
    %c0_i32 = arith.constant 0 : i32
    %c0_i32_0 = arith.constant 0 : i32
    %c0_i32_1 = arith.constant 0 : i32
    return %c0_i32, %c0_i32_0 : i32, i32
  }
  func.func @transform_4(%arg0: i32) -> (i32, i32) {
    %c0_i32 = arith.constant 0 : i32
    %c0_i32_0 = arith.constant 0 : i32
    %c0_i32_1 = arith.constant 0 : i32
    return %c0_i32, %c0_i32_0 : i32, i32
  }
  func.func @transform_5(%arg0: i32) -> (i32, i32) {
    %c0_i32 = arith.constant 0 : i32
    %c0_i32_0 = arith.constant 0 : i32
    %c0_i32_1 = arith.constant 0 : i32
    return %c0_i32, %c0_i32_0 : i32, i32
  }
  func.func @transform_6(%arg0: i32) -> (i32, i32) {
    %c0_i32 = arith.constant 0 : i32
    %c0_i32_0 = arith.constant 0 : i32
    %c0_i32_1 = arith.constant 0 : i32
    return %c0_i32, %c0_i32_0 : i32, i32
  }
  func.func @transform_7(%arg0: i32) -> (i32, i32) {
    %c0_i32 = arith.constant 0 : i32
    %c0_i32_0 = arith.constant 0 : i32
    %c0_i32_1 = arith.constant 0 : i32
    return %c0_i32, %c0_i32_0 : i32, i32
  }
  func.func @transform_8(%arg0: i32) -> (i32, i32) {
    %c0_i32 = arith.constant 0 : i32
    %c0_i32_0 = arith.constant 0 : i32
    %c0_i32_1 = arith.constant 0 : i32
    return %c0_i32, %c0_i32_0 : i32, i32
  }
  func.func @transform_9(%arg0: i32) -> (i32, i32) {
    %c0_i32 = arith.constant 0 : i32
    %c0_i32_0 = arith.constant 0 : i32
    %c0_i32_1 = arith.constant 0 : i32
    return %c0_i32, %c0_i32_0 : i32, i32
  }
  func.func @transform_10(%arg0: i32) -> (i32, i32) {
    %c0_i32 = arith.constant 0 : i32
    %c0_i32_0 = arith.constant 0 : i32
    %c0_i32_1 = arith.constant 0 : i32
    return %c0_i32, %c0_i32_0 : i32, i32
  }
  func.func @transform_11(%arg0: i32) -> (i32, i32) {
    %c0_i32 = arith.constant 0 : i32
    %c0_i32_0 = arith.constant 0 : i32
    %c0_i32_1 = arith.constant 0 : i32
    return %c0_i32, %c0_i32_0 : i32, i32
  }
  func.func @transform_12(%arg0: i32) -> (i32, i32) {
    %c0_i32 = arith.constant 0 : i32
    %c0_i32_0 = arith.constant 0 : i32
    %c0_i32_1 = arith.constant 0 : i32
    return %c0_i32, %c0_i32_0 : i32, i32
  }
  func.func @transform_13(%arg0: i32) -> (i32, i32) {
    %c0_i32 = arith.constant 0 : i32
    %c0_i32_0 = arith.constant 0 : i32
    %c0_i32_1 = arith.constant 0 : i32
    return %c0_i32, %c0_i32_0 : i32, i32
  }
  func.func @transform_14(%arg0: i32) -> (i32, i32) {
    %c0_i32 = arith.constant 0 : i32
    %c0_i32_0 = arith.constant 0 : i32
    %c0_i32_1 = arith.constant 0 : i32
    return %c0_i32, %c0_i32_0 : i32, i32
  }
  func.func @transform_15(%arg0: i32) -> (i32, i32) {
    %c0_i32 = arith.constant 0 : i32
    %c0_i32_0 = arith.constant 0 : i32
    %c0_i32_1 = arith.constant 0 : i32
    return %c0_i32, %c0_i32_0 : i32, i32
  }
  func.func @transform_16(%arg0: i32) -> (i32, i32) {
    %c0_i32 = arith.constant 0 : i32
    %c0_i32_0 = arith.constant 0 : i32
    %c0_i32_1 = arith.constant 0 : i32
    return %c0_i32, %c0_i32_0 : i32, i32
  }
  func.func @transform_17(%arg0: i32) -> (i32, i32) {
    %c0_i32 = arith.constant 0 : i32
    %c0_i32_0 = arith.constant 0 : i32
    %c0_i32_1 = arith.constant 0 : i32
    return %c0_i32, %c0_i32_0 : i32, i32
  }
  func.func @transform_18(%arg0: i32) -> (i32, i32) {
    %c0_i32 = arith.constant 0 : i32
    %c0_i32_0 = arith.constant 0 : i32
    return %arg0, %c0_i32 : i32, i32
  }
}

</mosaic_0001>

<bundles_post_ra>
// kernel: tpu_custom_call.1
= control target key start
LH: loop header
LB: loop body
LE: loop exit
PB: predicated region body
PF: predicated region fallthrough
CT: control target
= control target key end

     0   :  { %s3674_s0 = inlined_call_operand.hbm [shape: f32[16,64], index: 0, kind: input, shape index: {}]   ;;  %s3675_s1 = inlined_call_operand.hbm [shape: f32[64,256], index: 1, kind: input, shape index: {}]   ;;  %s3676_s2 = inlined_call_operand.vmem [shape: f32[1,256], index: 2, kind: input, shape index: {}]   ;;  %s3677_s3 = inlined_call_operand.vmem [shape: f32[256,128], index: 3, kind: input, shape index: {}]   ;;  %s3678_s4 = inlined_call_operand.hbm [shape: f32[128,256], index: 4, kind: input, shape index: {}]   ;;  %s3679_s5 = inlined_call_operand.hbm [shape: f32[1,256], index: 5, kind: input, shape index: {}]   ;;  %s3680_s6 = inlined_call_operand.hbm [shape: f32[256,128], index: 6, kind: input, shape index: {}]   ;;  %s3681_s7 = inlined_call_operand.hbm [shape: f32[128,256], index: 7, kind: input, shape index: {}]   ;;  %s3682_s8 = inlined_call_operand.hbm [shape: f32[1,256], index: 8, kind: input, shape index: {}]   ;;  %s3683_s9 = inlined_call_operand.vmem [shape: f32[256,128], index: 9, kind: input, shape index: {}]   ;;  %s3684_s10 = inlined_call_operand.hbm [shape: f32[128,256], index: 10, kind: input, shape index: {}]   ;;  %s3685_s11 = inlined_call_operand.hbm [shape: f32[1,256], index: 11, kind: input, shape index: {}]   ;;  %s3686_s12 = inlined_call_operand.vmem [shape: f32[256,64], index: 12, kind: input, shape index: {}]   ;;  %s3687_s13 = inlined_call_operand.vmem [shape: f32[1,64], index: 13, kind: input, shape index: {}]   ;;  %s3688_s14 = inlined_call_operand.vmem [shape: f32[64,16], index: 14, kind: input, shape index: {}]   ;;  %s3689_s15 = inlined_call_operand.vmem [shape: f32[1,16], index: 15, kind: input, shape index: {}]   ;;  %s3690_s16 = inlined_call_operand.vmem [shape: f32[16,1], index: 16, kind: input, shape index: {}]   ;;  %s3691_s17 = inlined_call_operand.<no memory space> [shape: f32[1,1], index: 17, kind: input, shape index: {}]   ;;  %s3692_s18 = inlined_call_operand.vmem [shape: f32[16,1], index: 18, kind: output, shape index: {}]  }
   0x1   :  { %3701 = sst [smem:[#allocation22_spill]] %s3674_s0  ;;  %v23_v0 = vstv %s3691_s17 }
   0x2   :  { %3702 = sst [smem:[#allocation23_spill]] %s3675_s1  ;;  %24 = vst [vmem:[#allocation2] sm:$0x1] %v23_v0 }
   0x3   :  { %3703 = sst [smem:[#allocation24_spill]] %s3676_s2 }
   0x4   :  { %3704 = sst [smem:[#allocation25_spill]] %s3679_s5 }
   0x5   :  { %3705 = sst [smem:[#allocation26_spill]] %s3683_s9 }
   0x6   :  { %3706 = sst [smem:[#allocation27_spill]] %s3686_s12 }
   0x7   :  { %3707 = sst [smem:[#allocation28_spill]] %s3687_s13 }
   0x8   :  { %3708 = sst [smem:[#allocation29_spill]] %s3688_s14 }
   0x9   :  { %3709 = sst [smem:[#allocation30_spill]] %s3689_s15 }
   0xa   :  { %3710 = sst [smem:[#allocation31_spill]] %s3690_s16 }
   0xb   :  { %3711 = sst [smem:[#allocation32_spill]] %s3692_s18 }
   0xc   :  { %25 = vsyncpa [#allocation4], 0 }
   0xd   :  { %27 = vsyncpa [#allocation4 + $0x1], 0 }
   0xe   :  { %28 = vsyncpa [#allocation6], 0 }
   0xf   :  { %29 = vsyncpa [#allocation9], 0 }
  0x10   :  { %30 = vsyncpa [#allocation12], 0 }
  0x11   :  { %31 = vsyncpa [#allocation15], 0  ;;  %s2967_s29 = smov 0   ;;  %s2969_s30 = smov 0  }
  0x12   :  { %s2971_s0 = smov 0   ;;  %s2973_s19 = smov 0  }
  0x13 LB: > { %s2852_s17 = smov [#allocation5]   ;;  %s2988_s20 = sadd.s32 4294967295, %s2850_s19   ;;  %s2850_s19 = sphi %s2973_s19, %s3741_s19   ;;  %s2846_s0 = sphi %s2971_s0, %s3740_s0   ;;  %s2842_s30 = sphi %s2969_s30, %s3739_s30   ;;  %s2838_s29 = sphi %s2967_s29, %s3738_s29  }
  0x14   : > { %s463_s1 = sshll.u32 %s2852_s17, 4  ;;  %p1935_p0 = scmp.ge.s32.totalorder %s2850_s19, 1  ;;  %s2993_s1 = int_to_ptr.vmem [resolvable:$true] %s463_s1 }
  0x15   : > { %p3699_p1 = scmp.eq.s32.totalorder %s2988_s20, 0  ;;  %p451_p2 = scmp.lt.s32.totalorder %s2850_s19, 3 }
  0x16   : > { %s2853_s22 = smov [#allocation8]   ;;  %s2854_s24 = smov [#allocation11]  }
  0x17   : > { %p2995_p3 = pnand %p1935_p0, %p451_p2  ;;  %s496_s2 = sshll.u32 %s2853_s22, 4  ;;  %s3007_s2 = int_to_ptr.vmem [resolvable:$true] %s496_s2 }
  0x18   : > { %s519_s25 = sshll.u32 %s2854_s24, 4  ;;  %s3714_s28 = sld [smem:[#allocation23_spill]]  ;;  %s3009_s25 = int_to_ptr.vmem [resolvable:$true] %s519_s25 }
  0x19   : > { %s3712_s21 = scalar_select %p2995_p3, 1, 0 }
  0x1a   : > { %p2433_p4 = pneg %p2995_p3 }
  0x1c   : > { %p3003_p5 = pnand %p2433_p4, %p3699_p1 }
  0x1e   : > { %s2546_s17 = scalar_lea.hbm %s3714_s28, 2048  ;;  %p3019_p7 = pneg %p3003_p5 }
  0x1f   : > { %p2547_p6 = scmp.ne.s32.totalorder %s3714_s28, %s2546_s17  ;;  %p2553_p10 = scmp.lt.u32.totalorder %s2546_s17, %s3714_s28 }
  0x21   : > { %p2549_p8 = pnand %p3019_p7, %p2547_p6 }
  0x23   : > { %p2550_p9 = pneg %p2549_p8 }
  0x25   : > { %p2555_p11 = pnand %p2553_p10, %p2550_p9 }
  0x27   : > { %2558 = shalt.err (!%p2555_p11)
}
  0x28   : > { %s2559_s15 = scalar_lea.vmem %s2993_s1, 2048  ;;  %p2567_p2 = scmp.lt.s32.totalorder %s2993_s1, %s2993_s1 }
  0x29   : > { %p2560_p12 = scmp.ne.s32.totalorder %s2993_s1, %s2559_s15  ;;  %p2568_p4 = scmp.lt.s32.totalorder %s2559_s15, %s2559_s15 }
  0x2b   : > { %p2562_p13 = pnand %p2560_p12, %p3019_p7  ;;  %p2569_p6 = por %p2568_p4, %p2567_p2 }
  0x2d   : > { %p2563_p0 = pneg %p2562_p13 }
  0x2f   : > { %p2570_p8 = pnand %p2569_p6, %p2563_p0 }
  0x31   : > { %2573 = shalt.err (!%p2570_p8)
}
  0x32   : > { %s2855_s18 = smov 256   ;;  %s2856_s16 = smov 16  }
  0x33   : > { %2436 = dma.hbm_to_vmem [thread:$0]  (!%p3003_p5), %s3714_s28, 2048, %s2993_s1, [#allocation6], %s2855_s18, %s2855_s18, %s2856_s16  }
  0x34   : > { %s3716_s5 = sld [smem:[#allocation25_spill]] }
  0x3a   : > { %s2574_s15 = scalar_lea.hbm %s3716_s5, 32 }
  0x3b   : > { %p2575_p9 = scmp.ne.s32.totalorder %s3716_s5, %s2574_s15  ;;  %p2581_p12 = scmp.lt.u32.totalorder %s2574_s15, %s3716_s5 }
  0x3d   : > { %p2577_p10 = pnand %p2575_p9, %p3019_p7 }
  0x3f   : > { %p2578_p11 = pneg %p2577_p10 }
  0x41   : > { %p2583_p13 = pnand %p2581_p12, %p2578_p11 }
  0x43   : > { %2586 = shalt.err (!%p2583_p13)
}
  0x44   : > { %s2587_s1 = scalar_lea.vmem %s3007_s2, 32  ;;  %p2595_p6 = scmp.lt.s32.totalorder %s3007_s2, %s3007_s2 }
  0x45   : > { %p2588_p0 = scmp.ne.s32.totalorder %s3007_s2, %s2587_s1  ;;  %p2596_p8 = scmp.lt.s32.totalorder %s2587_s1, %s2587_s1 }
  0x47   : > { %p2590_p2 = pnand %p2588_p0, %p3019_p7  ;;  %p2597_p9 = por %p2596_p8, %p2595_p6 }
  0x49   : > { %p2591_p4 = pneg %p2590_p2 }
  0x4b   : > { %p2598_p10 = pnand %p2597_p9, %p2591_p4 }
  0x4d   : > { %2601 = shalt.err (!%p2598_p10)
}
  0x4e   : > { %2442 = dma.hbm_to_vmem [thread:$0]  (!%p3003_p5), %s3716_s5, 32, %s3007_s2, [#allocation9]  }
  0x4f   : > { %s2602_s26 = scalar_lea.hbm %s3681_s7, 4096 }
  0x50   : > { %p2603_p11 = scmp.ne.s32.totalorder %s3681_s7, %s2602_s26  ;;  %p2609_p0 = scmp.lt.u32.totalorder %s2602_s26, %s3681_s7 }
  0x52   : > { %p2605_p12 = pnand %p2603_p11, %p3019_p7 }
  0x54   : > { %p2606_p13 = pneg %p2605_p12 }
  0x56   : > { %p2611_p2 = pnand %p2609_p0, %p2606_p13 }
  0x58   : > { %2614 = shalt.err (!%p2611_p2)
}
  0x59   : > { %s2615_s2 = scalar_lea.vmem %s3009_s25, 4096  ;;  %p2623_p9 = scmp.lt.s32.totalorder %s3009_s25, %s3009_s25 }
  0x5a   : > { %p2616_p4 = scmp.ne.s32.totalorder %s3009_s25, %s2615_s2  ;;  %p2624_p10 = scmp.lt.s32.totalorder %s2615_s2, %s2615_s2 }
  0x5c   : > { %p2618_p6 = pnand %p2616_p4, %p3019_p7  ;;  %p2625_p11 = por %p2624_p10, %p2623_p9 }
  0x5e   : > { %p2619_p8 = pneg %p2618_p6 }
  0x60   : > { %p2626_p12 = pnand %p2625_p11, %p2619_p8 }
  0x62   : > { %2629 = shalt.err (!%p2626_p12)
}
  0x63   : > { %2448 = dma.hbm_to_vmem [thread:$0]  (!%p3003_p5), %s3681_s7, 4096, %s3009_s25, [#allocation12], %s2855_s18, %s2855_s18, %s2856_s16  }
  0x64   : > { %s2857_s12 = smov [#allocation14]   ;;  %s2858_s14 = smov [#allocation7]  }
  0x65   : > { %s546_s13 = sshll.u32 %s2857_s12, 4  ;;  %s482_s26 = sshll.u32 %s2858_s14, 4  ;;  %s547_s13 = int_to_ptr.vmem [resolvable:$true] %s546_s13  ;;  %s483_s26 = int_to_ptr.vmem [resolvable:$true] %s482_s26 }
  0x66   : > { %s2630_s24 = scalar_lea.hbm %s3684_s10, 4096 }
  0x67   : > { %p2631_p13 = scmp.ne.s32.totalorder %s3684_s10, %s2630_s24  ;;  %p2637_p4 = scmp.lt.u32.totalorder %s2630_s24, %s3684_s10 }
  0x69   : > { %p2633_p0 = pnand %p2631_p13, %p3019_p7 }
  0x6b   : > { %p2634_p2 = pneg %p2633_p0 }
  0x6d   : > { %p2639_p6 = pnand %p2637_p4, %p2634_p2 }
  0x6f   : > { %2642 = shalt.err (!%p2639_p6)
}
  0x70   : > { %s2643_s25 = scalar_lea.vmem %s547_s13, 4096  ;;  %p2651_p11 = scmp.lt.s32.totalorder %s547_s13, %s547_s13 }
  0x71   : > { %p2644_p8 = scmp.ne.s32.totalorder %s547_s13, %s2643_s25  ;;  %p2652_p12 = scmp.lt.s32.totalorder %s2643_s25, %s2643_s25 }
  0x73   : > { %p2646_p9 = pnand %p2644_p8, %p3019_p7  ;;  %p2653_p1 = por %p2652_p12, %p2651_p11 }
  0x75   : > { %p2647_p10 = pneg %p2646_p9 }
  0x77   : > { %p2654_p3 = pnand %p2653_p1, %p2647_p10 }
  0x79   : > { %2657 = shalt.err (!%p2654_p3)
}
  0x7a   : > { %2454 = dma.hbm_to_vmem [thread:$0]  (!%p3003_p5), %s3684_s10, 4096, %s547_s13, [#allocation15], %s2855_s18, %s2855_s18, %s2856_s16  }
  0x7b   : > { %s2658_s27 = scalar_lea.hbm %s3678_s4, 4096 }
  0x7c   : > { %p2659_p1 = scmp.ne.s32.totalorder %s3678_s4, %s2658_s27  ;;  %p2665_p0 = scmp.lt.u32.totalorder %s2658_s27, %s3678_s4 }
  0x7e   : > { %p2661_p3 = pnand %p2659_p1, %p3019_p7 }
  0x80   : > { %p2662_p13 = pneg %p2661_p3 }
  0x82   : > { %p2667_p2 = pnand %p2665_p0, %p2662_p13 }
  0x84   : > { %2670 = shalt.err (!%p2667_p2)
}
  0x85   : > { %s2671_s1 = scalar_lea.vmem %s483_s26, 4096  ;;  %p2679_p9 = scmp.lt.s32.totalorder %s483_s26, %s483_s26 }
  0x86   : > { %p2672_p4 = scmp.ne.s32.totalorder %s483_s26, %s2671_s1  ;;  %p2680_p10 = scmp.lt.s32.totalorder %s2671_s1, %s2671_s1 }
  0x88   : > { %p2674_p6 = pnand %p2672_p4, %p3019_p7  ;;  %p2681_p11 = por %p2680_p10, %p2679_p9 }
  0x8a   : > { %p2675_p8 = pneg %p2674_p6 }
  0x8c   : > { %p2682_p12 = pnand %p2681_p11, %p2675_p8 }
  0x8e   : > { %2685 = shalt.err (!%p2682_p12)
}
  0x8f   : > { %2439 = dma.hbm_to_vmem [thread:$0]  (!%p3003_p5), %s3678_s4, 4096, %s483_s26, [#allocation6], %s2855_s18, %s2855_s18, %s2856_s16  }
  0x90   : > { %s2859_s5 = smov [#allocation10]   ;;  %s2686_s27 = scalar_lea.hbm %s3680_s6, 4096 }
  0x91   : > { %s506_s9 = sshll.u32 %s2859_s5, 4  ;;  %p2687_p1 = scmp.ne.s32.totalorder %s3680_s6, %s2686_s27  ;;  %s507_s9 = int_to_ptr.vmem [resolvable:$true] %s506_s9 }
  0x92   : > { %p2693_p0 = scmp.lt.u32.totalorder %s2686_s27, %s3680_s6 }
  0x93   : > { %p2689_p3 = pnand %p2687_p1, %p3019_p7 }
  0x95   : > { %p2690_p13 = pneg %p2689_p3 }
  0x97   : > { %p2695_p2 = pnand %p2693_p0, %p2690_p13 }
  0x99   : > { %2698 = shalt.err (!%p2695_p2)
}
  0x9a   : > { %s2699_s18 = scalar_lea.vmem %s507_s9, 4096  ;;  %p2707_p9 = scmp.lt.s32.totalorder %s507_s9, %s507_s9 }
  0x9b   : > { %p2700_p4 = scmp.ne.s32.totalorder %s507_s9, %s2699_s18  ;;  %p2708_p10 = scmp.lt.s32.totalorder %s2699_s18, %s2699_s18 }
  0x9d   : > { %p2702_p6 = pnand %p2700_p4, %p3019_p7  ;;  %p2709_p11 = por %p2708_p10, %p2707_p9 }
  0x9f   : > { %p2703_p8 = pneg %p2702_p6 }
  0xa1   : > { %p2710_p12 = pnand %p2709_p11, %p2703_p8 }
  0xa3   : > { %2713 = shalt.err (!%p2710_p12)
}
  0xa4   : > { %s2860_s16 = smov 128   ;;  %s2861_s26 = smov 8  }
  0xa5   : > { %2445 = dma.hbm_to_vmem [thread:$0]  (!%p3003_p5), %s3680_s6, 4096, %s507_s9, [#allocation9], %s2860_s16, %s2860_s16, %s2861_s26  }
  0xa6   : > { %s2862_s25 = smov [#allocation13]   ;;  %s2863_s12 = smov [#allocation16]  }
  0xa7   : > { %s533_s5 = sshll.u32 %s2862_s25, 4  ;;  %s560_s14 = sshll.u32 %s2863_s12, 4  ;;  %s534_s5 = int_to_ptr.vmem [resolvable:$true] %s533_s5  ;;  %s3152_s14 = int_to_ptr.vmem [resolvable:$true] %s560_s14 }
  0xa8   : > { %s2714_s24 = scalar_lea.hbm %s3682_s8, 32 }
  0xa9   : > { %p2715_p1 = scmp.ne.s32.totalorder %s3682_s8, %s2714_s24  ;;  %p2721_p0 = scmp.lt.u32.totalorder %s2714_s24, %s3682_s8 }
  0xab   : > { %p2717_p3 = pnand %p2715_p1, %p3019_p7 }
  0xad   : > { %p2718_p13 = pneg %p2717_p3 }
  0xaf   : > { %p2723_p2 = pnand %p2721_p0, %p2718_p13 }
  0xb1   : > { %2726 = shalt.err (!%p2723_p2)
}
  0xb2   : > { %s2727_s16 = scalar_lea.vmem %s534_s5, 32  ;;  %p2735_p9 = scmp.lt.s32.totalorder %s534_s5, %s534_s5 }
  0xb3   : > { %p2728_p4 = scmp.ne.s32.totalorder %s534_s5, %s2727_s16  ;;  %p2736_p10 = scmp.lt.s32.totalorder %s2727_s16, %s2727_s16 }
  0xb5   : > { %p2730_p6 = pnand %p2728_p4, %p3019_p7  ;;  %p2737_p11 = por %p2736_p10, %p2735_p9 }
  0xb7   : > { %p2731_p8 = pneg %p2730_p6 }
  0xb9   : > { %p2738_p12 = pnand %p2737_p11, %p2731_p8 }
  0xbb   : > { %2741 = shalt.err (!%p2738_p12)
}
  0xbc   : > { %2451 = dma.hbm_to_vmem [thread:$0]  (!%p3003_p5), %s3682_s8, 32, %s534_s5, [#allocation12]  }
  0xbd   : > { %s2742_s12 = scalar_lea.hbm %s3685_s11, 32 }
  0xbe   : > { %p2743_p1 = scmp.ne.s32.totalorder %s3685_s11, %s2742_s12  ;;  %p2749_p0 = scmp.lt.u32.totalorder %s2742_s12, %s3685_s11 }
  0xc0   : > { %p2745_p3 = pnand %p2743_p1, %p3019_p7 }
  0xc2   : > { %p2746_p13 = pneg %p2745_p3 }
  0xc4   : > { %p2751_p2 = pnand %p2749_p0, %p2746_p13 }
  0xc6   : > { %2754 = shalt.err (!%p2751_p2)
}
  0xc7   : > { %s2755_s5 = scalar_lea.vmem %s3152_s14, 32  ;;  %p2763_p9 = scmp.lt.s32.totalorder %s3152_s14, %s3152_s14 }
  0xc8   : > { %p2756_p4 = scmp.ne.s32.totalorder %s3152_s14, %s2755_s5  ;;  %p2764_p10 = scmp.lt.s32.totalorder %s2755_s5, %s2755_s5 }
  0xca   : > { %p2758_p6 = pnand %p2756_p4, %p3019_p7  ;;  %p2765_p11 = por %p2764_p10, %p2763_p9 }
  0xcc   : > { %p2759_p8 = pneg %p2758_p6 }
  0xce   : > { %p2766_p12 = pnand %p2765_p11, %p2759_p8 }
  0xd0   : > { %2769 = shalt.err (!%p2766_p12)
}
  0xd1   : > { %2457 = dma.hbm_to_vmem [thread:$0]  (!%p3003_p5), %s3685_s11, 32, %s3152_s14, [#allocation15]  }
  0xd2   : > { %s3196_s22 = sadd.s32 1, %s2850_s19   ;;  %s44_s23 = sadd.s32 1, %s2846_s0 }
  0xd3   : > { %s41_s9 = ssub.s32 %s2850_s19, %s3196_s22  ;;  %p51_p7 = scmp.ne.s32.totalorder %s2846_s0, %s2842_s30 }
  0xd4   : > { %p42_p1 = scmp.eq.s32.totalorder %s41_s9, 0  ;;  %p52_p3 = scmp.eq.s32.totalorder %s2850_s19, 0 }
  0xd5   : > { %p57_p13 = scmp.ne.s32.totalorder %s2842_s30, %s2838_s29  ;;  %p2470_p0 = scmp.lt.s32.totalorder %s2850_s19, 2 }
  0xd6   : > { %s3208_s16 = scalar_select %p42_p1, %s2846_s0, %s44_s23  }
  0xd7   : > { %p53_p2 = por %p52_p3, %p51_p7  ;;  %p3717_p4 = scmp.eq.s32.totalorder %s2988_s20, 0 }
  0xd8   : > { %s589_s1 = sand.u32 1, %s2846_s0   ;;  %s1946_s14 = sshll.u32 %s2850_s19, 7 }
  0xd9   : > { %p3212_p6 = por %p3717_p4, %p57_p13  ;;  %s1945_s13 = sshll.u32 %s589_s1, 3 }
  0xda   : > { %s3719_s27 = sld [smem:[#allocation22_spill]]  ;;  %s593_s29 = scalar_lea.vmem [#allocation3], %s1945_s13 }
  0xdb   : > { %s600_s24 = sshll.u32 %s593_s29, 4  ;;  %p3223_p5 = pnand %p2470_p0, %p53_p2  ;;  %s3227_s24 = int_to_ptr.vmem [resolvable:$true] %s600_s24 }
  0xdc   : > { %s590_s19 = scalar_lea.sflag [#allocation4], %s589_s1 }
  0xdd   : > { %p2772_p9 = pneg %p3223_p5 }
  0xe0   : > { %s3221_s17 = scalar_lea.hbm %s3719_s27, %s1946_s14  ;;  %s2775_s23 = scalar_lea.hbm %s3719_s27, 256 }
  0xe1   : > { %s2770_s5 = scalar_lea.hbm %s3221_s17, 128  ;;  %p2776_p12 = scmp.lt.u32.totalorder %s3221_s17, %s3719_s27 }
  0xe2   : > { %p2771_p8 = scmp.ne.s32.totalorder %s3221_s17, %s2770_s5  ;;  %p2777_p7 = scmp.lt.u32.totalorder %s2775_s23, %s2770_s5 }
  0xe3   : > { %p2779_p3 = scmp.lt.u32.totalorder %s2770_s5, %s3221_s17 }
  0xe4   : > { %p2773_p10 = pnand %p2772_p9, %p2771_p8  ;;  %p2778_p1 = por %p2777_p7, %p2776_p12 }
  0xe6   : > { %p2774_p11 = pneg %p2773_p10  ;;  %p2780_p13 = por %p2779_p3, %p2778_p1 }
  0xe8   : > { %p2781_p0 = pnand %p2780_p13, %p2774_p11 }
  0xea   : > { %2784 = shalt.err (!%p2781_p0)
}
  0xeb   : > { %s2785_s1 = scalar_lea.vmem %s3227_s24, 128  ;;  %s2864_s13 = smov [#allocation3]  }
  0xec   : > { %p2786_p2 = scmp.ne.s32.totalorder %s3227_s24, %s2785_s1  ;;  %s2790_s25 = sshll.u32 %s2864_s13, 4  ;;  %s2791_s25 = int_to_ptr.vmem [resolvable:$false] %s2790_s25 }
  0xed   : > { %s2792_s12 = scalar_lea.vmem %s2791_s25, 256  ;;  %p2793_p10 = scmp.lt.s32.totalorder %s3227_s24, %s2791_s25 }
  0xee   : > { %p2788_p4 = pnand %p2786_p2, %p2772_p9  ;;  %p2794_p12 = scmp.lt.s32.totalorder %s2792_s12, %s2785_s1 }
  0xf0   : > { %p2789_p8 = pneg %p2788_p4  ;;  %p2795_p7 = por %p2794_p12, %p2793_p10 }
  0xf2   : > { %p2796_p1 = pnand %p2795_p7, %p2789_p8 }
  0xf4   : > { %2799 = shalt.err (!%p2796_p1)
}
  0xf5   : > { %2461 = dma.hbm_to_vmem [thread:$0]  (!%p3223_p5), %s3221_s17, 128, %s3227_s24, %s590_s19  }
  0xf6   : > { %p3721_p11 = scmp.ne.s32.totalorder %s3712_s21, 0 }
  0xf7   : > { %s611_s29 = sand.u32 (!%p3721_p11), 1, %s2842_s30  }
  0xf8   : > { %609 = sbr.rel (%p3721_p11) target bundleno = 2849 (0xb21), region = 92  ;;  %s3257_s5 = sshll.u32 (!%p3721_p11), %s611_s29, 3 }
  0xf9   : > { %s612_s2 = scalar_lea.sflag (!%p3721_p11), [#allocation4], %s611_s29  ;;  %s615_s18 = scalar_lea.vmem (!%p3721_p11), [#allocation3], %s3257_s5 }
  0xff   : > { %2817 = dma.done.wait (%p3212_p6), %s612_s2, 128  }
 0x100   : > { %2819 = vsyncadd (%p3212_p6), %s612_s2, 4294967168  ;;  %p3722_p9 = scmp.eq.s32.totalorder %s2988_s20, 0 }
 0x102   : > { %2821 = dma.done.wait (%p3722_p9), [#allocation6], 6144   ;;  %p3723_p5 = pmov %p3722_p9 }
 0x104   : > { %2823 = vsyncadd (%p3723_p5), [#allocation6], 4294961152  ;;  %p3724_p3 = pmov %p3723_p5 }
 0x106   : > { %2825 = dma.done.wait (%p3724_p3), [#allocation9], 4128   ;;  %p3725_p13 = pmov %p3724_p3 }
 0x107   : > { %p3726_p0 = pmov %p3724_p3 }
 0x108   : > { %2827 = vsyncadd (%p3725_p13), [#allocation9], 4294963168 }
 0x109   : > { %2829 = dma.done.wait (%p3726_p0), [#allocation12], 4128   ;;  %p3727_p2 = pmov %p3726_p0 }
 0x10a   : > { %p3728_p6 = pmov %p3726_p0 }
 0x10b   : > { %2831 = vsyncadd (%p3727_p2), [#allocation12], 4294963168 }
 0x10c   : > { %2833 = dma.done.wait (%p3728_p6), [#allocation15], 4128   ;;  %p3729_p4 = pmov %p3726_p0 }
 0x10d   : > { %v2865_v1 = vmov 0.0   ;;  %v705_v2 = vld [vmem:[#allocation5 + $0x8] sm:$0xff]  ;;  %v707_v3 = vld [vmem:[#allocation5 + $0x18] sm:$0xff]  ;;  %v704_v4 = vld [vmem:[#allocation5] sm:$0xff]  ;;  %vm732_vm0 = vcmask 523264   ;;  %s3730_s9 = sld [smem:[#allocation24_spill]] }
 0x10e   : > { %2835 = vsyncadd (%p3729_p4), [#allocation15], 4294963168  ;;  %800 = vmatprep.mubr.f32.mxu0 %v2865_v1  ;;  %v2144_v5 = vpack.c.bf16 %v707_v3, %v705_v2  ;;  %v706_v6 = vld [vmem:[#allocation5 + $0x10] sm:$0xff]  ;;  %v709_v7 = vld [vmem:[#allocation5 + $0x28] sm:$0xff]  ;;  %vm815_vm1 = vcmask 1039360   ;;  %s3731_s17 = sld [smem:[#allocation26_spill]] }
 0x10f   : > { %v711_v8 = vld [vmem:[#allocation5 + $0x38] sm:$0xff]  ;;  %v2146_v9 = vpack.c.bf16 %v706_v6, %v704_v4  ;;  %v708_v11 = vld [vmem:[#allocation5 + $0x20] sm:$0xff]  ;;  %v710_v12 = vld [vmem:[#allocation5 + $0x30] sm:$0xff]  ;;  %v722_v6 = vlaneseq  ;;  %s3732_s23 = sld [smem:[#allocation27_spill]]  ;;  %s3733_s25 = sld [smem:[#allocation29_spill]]  ;;  %vm2868_vm2 = vmmov 0  }
 0x110   : > { %v2148_v10 = vpack.c.bf16 %v711_v8, %v709_v7  ;;  %v713_v13 = vld [vmem:[#allocation5 + $0x48] sm:$0xff]  ;;  %2145 = vmatprep.subr.bf16.mxu0 %v2144_v5  ;;  %v715_v14 = vld [vmem:[#allocation5 + $0x58] sm:$0xff]  ;;  %v2150_v15 = vpack.c.bf16 %v710_v12, %v708_v11  ;;  %v712_v17 = vld [vmem:[#allocation5 + $0x40] sm:$0xff]  ;;  %s3734_s5 = sld [smem:[#allocation28_spill]]  ;;  %s3735_s26 = sld [smem:[#allocation31_spill]]  ;;  %vm1711_vm3 = vcmask 130048  }
 0x111   : > { %2147 = vmatpush1.bf16.msra.mxu0 %v2146_v9  ;;  %v2152_v16 = vpack.c.bf16 %v715_v14, %v713_v13  ;;  %v714_v18 = vld [vmem:[#allocation5 + $0x50] sm:$0xff]  ;;  %v717_v19 = vld [vmem:[#allocation5 + $0x68] sm:$0xff]  ;;  %v719_v20 = vld [vmem:[#allocation5 + $0x78] sm:$0xff]  ;;  %v723_v7 = vshrl.u32 %v722_v6, 7  ;;  %p699_p8 = scmp.lt.s32.totalorder %s2988_s20, 1  ;;  %s3737_s12 = sld [smem:[#allocation32_spill]] }
 0x112   : > { %2149 = vmatprep.subr.bf16.mxu0 %v2148_v10  ;;  %v2154_v21 = vpack.c.bf16 %v714_v18, %v712_v17  ;;  %v2156_v22 = vpack.c.bf16 %v719_v20, %v717_v19  ;;  %v716_v23 = vld [vmem:[#allocation5 + $0x60] sm:$0xff]  ;;  %v718_v24 = vld [vmem:[#allocation5 + $0x70] sm:$0xff]  ;;  %vm1791_vm4 = vcmask 7168  }
 0x113   : > { %v2158_v25 = vpack.c.bf16 %v718_v24, %v716_v23  ;;  %v703_v26 = vld [vmem:[%s615_s18] sm:$0xff]  ;;  %v841_v33 = vld [vmem:[%s3677_s3 + $0x98] sm:$0xff]  ;;  %v3369_v8 = vsub.s32 0, %v723_v7  ;;  %v3374_v10 = vsub.s32 1, %v723_v7  ;;  %s2866_s18 = smov 127   ;;  %s3743_s20 = smov (!%p699_p8, %s2988_s20), 1 }
 0x114   : > { %v838_v27 = vld [vmem:[%s3677_s3 + $0x80] sm:$0xff]  ;;  %v839_v28 = vld [vmem:[%s3677_s3 + $0x88] sm:$0xff]  ;;  %v840_v32 = vld [vmem:[%s3677_s3 + $0x90] sm:$0xff]  ;;  %s1957_s14 = sshll.u32 %s3743_s20, 3 }
 0x115   : > { %2151 = vmatpush1.bf16.msra.mxu0 %v2150_v15  ;;  %v822_v29 = vld [vmem:[%s3677_s3] sm:$0xff]  ;;  %v2160_v30 = vpack.c.bf16 %v839_v28, %v838_v27  ;;  %v823_v31 = vld [vmem:[%s3677_s3 + $0x8] sm:$0xff]  ;;  %v2164_v35 = vpack.c.bf16 %v841_v33, %v840_v32  ;;  %v824_v36 = vld [vmem:[%s3677_s3 + $0x10] sm:$0xff] }
 0x116   : > { %2153 = vmatprep.subr.bf16.mxu0 %v2152_v16  ;;  %v2162_v34 = vpack.c.bf16 %v823_v31, %v822_v29  ;;  %v825_v37 = vld [vmem:[%s3677_s3 + $0x18] sm:$0xff]  ;;  %v842_v38 = vld [vmem:[%s3677_s3 + $0xa0] sm:$0xff]  ;;  %v843_v39 = vld [vmem:[%s3677_s3 + $0xa8] sm:$0xff] }
 0x117   : > { %2161 = vmatprep.subr.bf16.mxu1 %v2160_v30  ;;  %v2166_v40 = vpack.c.bf16 %v825_v37, %v824_v36  ;;  %v2168_v41 = vpack.c.bf16 %v843_v39, %v842_v38  ;;  %v826_v42 = vld [vmem:[%s3677_s3 + $0x20] sm:$0xff]  ;;  %v827_v43 = vld [vmem:[%s3677_s3 + $0x28] sm:$0xff]  ;;  %v844_v44 = vld [vmem:[%s3677_s3 + $0xb0] sm:$0xff]  ;;  %s702_s29 = scalar_lea.vmem %s3737_s12, %s1957_s14 }
 0x118   : > { %2163 = vmatpush3.bf16.msra.mxu1 %v2162_v34  ;;  %v845_v45 = vld [vmem:[%s3677_s3 + $0xb8] sm:$0xff]  ;;  %v2170_v46 = vpack.c.bf16 %v827_v43, %v826_v42  ;;  %v828_v48 = vld [vmem:[%s3677_s3 + $0x30] sm:$0xff]  ;;  %v846_v50 = vld [vmem:[%s3677_s3 + $0xc0] sm:$0xff] }
 0x119   : > { %2155 = vmatpush1.bf16.msra.mxu0 %v2154_v21  ;;  %2165 = vmatprep.subr.bf16.mxu1 %v2164_v35  ;;  %v2172_v47 = vpack.c.bf16 %v845_v45, %v844_v44  ;;  %v829_v49 = vld [vmem:[%s3677_s3 + $0x38] sm:$0xff]  ;;  %v847_v51 = vld [vmem:[%s3677_s3 + $0xc8] sm:$0xff]  ;;  %v830_v54 = vld [vmem:[%s3677_s3 + $0x40] sm:$0xff] }
 0x11a   : > { %2157 = vmatprep.subr.bf16.mxu0 %v2156_v22  ;;  %v2174_v52 = vpack.c.bf16 %v829_v49, %v828_v48  ;;  %v2176_v53 = vpack.c.bf16 %v847_v51, %v846_v50  ;;  %v831_v55 = vld [vmem:[%s3677_s3 + $0x48] sm:$0xff]  ;;  %v848_v56 = vld [vmem:[%s3677_s3 + $0xd0] sm:$0xff]  ;;  %v849_v57 = vld [vmem:[%s3677_s3 + $0xd8] sm:$0xff] }
 0x11b   : > { %v2178_v58 = vpack.c.bf16 %v831_v55, %v830_v54  ;;  %v2180_v59 = vpack.c.bf16 %v849_v57, %v848_v56  ;;  %v832_v60 = vld [vmem:[%s3677_s3 + $0x50] sm:$0xff]  ;;  %v833_v61 = vld [vmem:[%s3677_s3 + $0x58] sm:$0xff]  ;;  %v850_v62 = vld [vmem:[%s3677_s3 + $0xe0] sm:$0xff] }
 0x11c   : > { %2167 = vmatpush3.bf16.msra.mxu1 %v2166_v40  ;;  %v851_v63 = vld [vmem:[%s3677_s3 + $0xe8] sm:$0xff]  ;;  %v2182_v0 = vpack.c.bf16 %v833_v61, %v832_v60  ;;  %v834_v3 = vld [vmem:[%s3677_s3 + $0x60] sm:$0xff]  ;;  %v852_v11 = vld [vmem:[%s3677_s3 + $0xf0] sm:$0xff] }
 0x11d   : > { %2159 = vmatpush1.bf16.msra.mxu0 %v2158_v25  ;;  %2169 = vmatprep.subr.bf16.mxu1 %v2168_v41  ;;  %v2184_v2 = vpack.c.bf16 %v851_v63, %v850_v62  ;;  %v835_v4 = vld [vmem:[%s3677_s3 + $0x68] sm:$0xff]  ;;  %v720_v9 = vld [vmem:[%s3730_s9] sm:$0x3]  ;;  %v853_v12 = vld [vmem:[%s3677_s3 + $0xf8] sm:$0xff]  ;;  %s3736_s9 = sld [smem:[#allocation30_spill]] }
 0x11e   : > { %v2186_v5 = vpack.c.bf16 %v835_v4, %v834_v3  ;;  %v2188_v13 = vpack.c.bf16 %v853_v12, %v852_v11  ;;  %v836_v14 = vld [vmem:[%s3677_s3 + $0x70] sm:$0xff]  ;;  %v837_v15 = vld [vmem:[%s3677_s3 + $0x78] sm:$0xff]  ;;  %v725_v17 = vrot.slane %v720_v9, %v3369_v8  ;;  %v729_v18 = vrot.slane %v720_v9, %v3374_v10  ;;  %v926_v27 = vld [vmem:[#allocation7 + $0x10] sm:$0xff] }
 0x11f   : > { %v2190_v16 = vpack.c.bf16 %v837_v15, %v836_v14  ;;  %v925_v22 = vld [vmem:[#allocation7 + $0x8] sm:$0xff]  ;;  %v927_v23 = vld [vmem:[#allocation7 + $0x18] sm:$0xff]  ;;  %v924_v24 = vld [vmem:[#allocation7] sm:$0xff] }
 0x120   : > { %1958 = vmatmul.mubr.msk.f32.vlgmr.msra.gmra.mrb[0].mxu0 %vm732_vm0, %v703_v26  ;;  %2171 = vmatpush3.bf16.msra.mxu1 %v2170_v46  ;;  %v2192_v26 = vpack.c.bf16 %v927_v23, %v925_v22  ;;  %v929_v28 = vld [vmem:[#allocation7 + $0x28] sm:$0xff]  ;;  %v931_v29 = vld [vmem:[#allocation7 + $0x38] sm:$0xff]  ;;  %v2194_v31 = vpack.c.bf16 %v926_v27, %v924_v24  ;;  %v928_v33 = vld [vmem:[#allocation7 + $0x20] sm:$0xff] }
 0x121   : > { %1032 = vmatprep.mubr.f32.mxu0 %v2865_v1  ;;  %2173 = vmatprep.subr.bf16.mxu1 %v2172_v47  ;;  %v2196_v32 = vpack.c.bf16 %v931_v29, %v929_v28  ;;  %v930_v34 = vld [vmem:[#allocation7 + $0x30] sm:$0xff]  ;;  %v933_v35 = vld [vmem:[#allocation7 + $0x48] sm:$0xff]  ;;  %v935_v37 = vld [vmem:[#allocation7 + $0x58] sm:$0xff] }
 0x122   : > { %2193 = vmatprep.subr.bf16.mxu0 %v2192_v26  ;;  %v2198_v38 = vpack.c.bf16 %v930_v34, %v928_v33  ;;  %v2200_v40 = vpack.c.bf16 %v935_v37, %v933_v35  ;;  %v932_v41 = vld [vmem:[#allocation7 + $0x40] sm:$0xff]  ;;  %v934_v42 = vld [vmem:[#allocation7 + $0x50] sm:$0xff]  ;;  %v937_v43 = vld [vmem:[#allocation7 + $0x68] sm:$0xff] }
 0x123   : > { %2195 = vmatpush1.bf16.msra.mxu0 %v2194_v31  ;;  %v939_v44 = vld [vmem:[#allocation7 + $0x78] sm:$0xff]  ;;  %v2202_v45 = vpack.c.bf16 %v934_v42, %v932_v41  ;;  %v936_v47 = vld [vmem:[#allocation7 + $0x60] sm:$0xff]  ;;  %v938_v48 = vld [vmem:[#allocation7 + $0x70] sm:$0xff] }
 0x124   : > { %2175 = vmatpush3.bf16.msra.mxu1 %v2174_v52  ;;  %2197 = vmatprep.subr.bf16.mxu0 %v2196_v32  ;;  %v2204_v46 = vpack.c.bf16 %v939_v44, %v937_v43  ;;  %v941_v49 = vld [vmem:[#allocation7 + $0x88] sm:$0xff]  ;;  %v943_v50 = vld [vmem:[#allocation7 + $0x98] sm:$0xff]  ;;  %v2206_v51 = vpack.c.bf16 %v938_v48, %v936_v47  ;;  %v942_v54 = vld [vmem:[#allocation7 + $0x90] sm:$0xff] }
 0x125   : > { %2177 = vmatprep.subr.bf16.mxu1 %v2176_v53  ;;  %v2208_v52 = vpack.c.bf16 %v943_v50, %v941_v49  ;;  %v940_v53 = vld [vmem:[#allocation7 + $0x80] sm:$0xff]  ;;  %v945_v55 = vld [vmem:[#allocation7 + $0xa8] sm:$0xff]  ;;  %v947_v56 = vld [vmem:[#allocation7 + $0xb8] sm:$0xff] }
 0x126   : > { %v2210_v57 = vpack.c.bf16 %v942_v54, %v940_v53  ;;  %v946_v60 = vld [vmem:[#allocation7 + $0xb0] sm:$0xff]  ;;  %v949_v61 = vld [vmem:[#allocation7 + $0xc8] sm:$0xff]  ;;  %v951_v62 = vld [vmem:[#allocation7 + $0xd8] sm:$0xff] }
 0x127   : > { %2199 = vmatpush1.bf16.msra.mxu0 %v2198_v38  ;;  %v950_v3 = vld [vmem:[#allocation7 + $0xd0] sm:$0xff]  ;;  %v953_v14 = vld [vmem:[#allocation7 + $0xe8] sm:$0xff]  ;;  %v955_v15 = vld [vmem:[#allocation7 + $0xf8] sm:$0xff] }
 0x128   : > { %2179 = vmatpush3.bf16.msra.mxu1 %v2178_v58  ;;  %2201 = vmatprep.subr.bf16.mxu0 %v2200_v40  ;;  %v2212_v58 = vpack.c.bf16 %v947_v56, %v945_v55  ;;  %v1069_v23 = vld [vmem:[#allocation10 + $0x80] sm:$0xff]  ;;  %v1070_v24 = vld [vmem:[#allocation10 + $0x88] sm:$0xff]  ;;  %v1071_v28 = vld [vmem:[#allocation10 + $0x90] sm:$0xff] }
 0x129   : > { %2181 = vmatprep.subr.bf16.mxu1 %v2180_v59  ;;  %v944_v59 = vld [vmem:[#allocation7 + $0xa0] sm:$0xff]  ;;  %v2224_v26 = vpack.c.bf16 %v1070_v24, %v1069_v23  ;;  %v1054_v27 = vld [vmem:[#allocation10 + $0x8] sm:$0xff]  ;;  %v1055_v32 = vld [vmem:[#allocation10 + $0x10] sm:$0xff] }
 0x12a   : > { %v2214_v63 = vpack.c.bf16 %v946_v60, %v944_v59  ;;  %v1072_v29 = vld [vmem:[#allocation10 + $0x98] sm:$0xff]  ;;  %v1073_v34 = vld [vmem:[#allocation10 + $0xa0] sm:$0xff]  ;;  %v1074_v35 = vld [vmem:[#allocation10 + $0xa8] sm:$0xff] }
 0x12b   : > { %2203 = vmatpush1.bf16.msra.mxu0 %v2202_v45  ;;  %v2228_v31 = vpack.c.bf16 %v1072_v29, %v1071_v28  ;;  %v1056_v33 = vld [vmem:[#allocation10 + $0x18] sm:$0xff]  ;;  %v2232_v37 = vpack.c.bf16 %v1074_v35, %v1073_v34  ;;  %v1057_v38 = vld [vmem:[#allocation10 + $0x20] sm:$0xff]  ;;  %v1075_v40 = vld [vmem:[#allocation10 + $0xb0] sm:$0xff] }
 0x12c   : > { %2183 = vmatpush3.bf16.msra.mxu1 %v2182_v0  ;;  %2205 = vmatprep.subr.bf16.mxu0 %v2204_v46  ;;  %v2216_v0 = vpack.c.bf16 %v951_v62, %v949_v61  ;;  %v1076_v41 = vld [vmem:[#allocation10 + $0xb8] sm:$0xff]  ;;  %v1059_v44 = vld [vmem:[#allocation10 + $0x30] sm:$0xff]  ;;  %v1077_v46 = vld [vmem:[#allocation10 + $0xc0] sm:$0xff] }
 0x12d   : > { %2185 = vmatprep.subr.bf16.mxu1 %v2184_v2  ;;  %v948_v2 = vld [vmem:[#allocation7 + $0xc0] sm:$0xff]  ;;  %v2236_v43 = vpack.c.bf16 %v1076_v41, %v1075_v40  ;;  %v1078_v47 = vld [vmem:[#allocation10 + $0xc8] sm:$0xff]  ;;  %v1063_v56 = vld [vmem:[#allocation10 + $0x50] sm:$0xff] }
 0x12e   : > { %v2218_v4 = vpack.c.bf16 %v950_v3, %v948_v2  ;;  %v1060_v45 = vld [vmem:[#allocation10 + $0x38] sm:$0xff]  ;;  %v2240_v49 = vpack.c.bf16 %v1078_v47, %v1077_v46  ;;  %v1061_v50 = vld [vmem:[#allocation10 + $0x40] sm:$0xff]  ;;  %v1082_v59 = vld [vmem:[#allocation10 + $0xe8] sm:$0xff] }
 0x12f   : > { %2207 = vmatpush1.bf16.msra.mxu0 %v2206_v51  ;;  %v2238_v48 = vpack.c.bf16 %v1060_v45, %v1059_v44  ;;  %v1062_v51 = vld [vmem:[#allocation10 + $0x48] sm:$0xff]  ;;  %v1080_v53 = vld [vmem:[#allocation10 + $0xd8] sm:$0xff]  ;;  %v1065_v62 = vld [vmem:[#allocation10 + $0x60] sm:$0xff] }
 0x130   : > { %2187 = vmatpush3.bf16.msra.mxu1 %v2186_v5  ;;  %2209 = vmatprep.subr.bf16.mxu0 %v2208_v52  ;;  %v1079_v52 = vld [vmem:[#allocation10 + $0xd0] sm:$0xff]  ;;  %v2242_v54 = vpack.c.bf16 %v1062_v51, %v1061_v50  ;;  %v956_v2 = vld [vmem:[#allocation8] sm:$0x3]  ;;  %v1164_v29 = vld [vmem:[#allocation11 + $0x48] sm:$0xff] }
 0x131   : > { %2189 = vmatprep.subr.bf16.mxu1 %v2188_v13  ;;  %v2244_v55 = vpack.c.bf16 %v1080_v53, %v1079_v52  ;;  %v1083_v3 = vld [vmem:[#allocation10 + $0xf0] sm:$0xff]  ;;  %v1162_v23 = vld [vmem:[#allocation11 + $0x38] sm:$0xff]  ;;  %v1163_v35 = vld [vmem:[#allocation11 + $0x40] sm:$0xff] }
 0x132   : > { %v1161_v28 = vld [vmem:[#allocation11 + $0x30] sm:$0xff]  ;;  %v1167_v41 = vld [vmem:[#allocation11 + $0x60] sm:$0xff]  ;;  %v1174_v44 = vld [vmem:[#allocation11 + $0x98] sm:$0xff] }
 0x133   : > { %2211 = vmatpush1.bf16.msra.mxu0 %v2210_v57  ;;  %v1064_v57 = vld [vmem:[#allocation10 + $0x58] sm:$0xff]  ;;  %v1171_v47 = vld [vmem:[#allocation11 + $0x80] sm:$0xff] }
 0x134   : > { %2191 = vmatpush3.bf16.msra.mxu1 %v2190_v16  ;;  %2213 = vmatprep.subr.bf16.mxu0 %v2212_v58  ;;  %v2220_v16 = vpack.c.bf16 %v955_v15, %v953_v14  ;;  %v1081_v58 = vld [vmem:[#allocation10 + $0xe0] sm:$0xff]  ;;  %v2246_v60 = vpack.c.bf16 %v1064_v57, %v1063_v56  ;;  %v1178_v50 = vld [vmem:[#allocation11 + $0xb8] sm:$0xff] }
 0x135   : > { %2225 = vmatprep.subr.bf16.mxu1 %v2224_v26  ;;  %v2248_v61 = vpack.c.bf16 %v1082_v59, %v1081_v58  ;;  %v1175_v53 = vld [vmem:[#allocation11 + $0xa0] sm:$0xff]  ;;  %v1182_v56 = vld [vmem:[#allocation11 + $0xd8] sm:$0xff] }
 0x136   : > { %v1179_v59 = vld [vmem:[#allocation11 + $0xc0] sm:$0xff] }
 0x137   : > { %2215 = vmatpush1.bf16.msra.mxu0 %v2214_v63  ;;  %v1066_v63 = vld [vmem:[#allocation10 + $0x68] sm:$0xff] }
 0x138   : > { %2217 = vmatprep.subr.bf16.mxu0 %v2216_v0  ;;  %v2250_v0 = vpack.c.bf16 %v1066_v63, %v1065_v62 }
 0x13b   : > { %2219 = vmatpush1.bf16.msra.mxu0 %v2218_v4  ;;  %v1084_v4 = vld [vmem:[#allocation10 + $0xf8] sm:$0xff] }
 0x13c   : > { %2221 = vmatprep.subr.bf16.mxu0 %v2220_v16  ;;  %v1156_v16 = vld [vmem:[#allocation11 + $0x8] sm:$0xff] }
 0x1f3   : > { %v802_v19 = vpop.f32.mrb[0].mxu0 }
 0x1f4   : > { %v3390_v20 = vadd.f32 %v802_v19, %v725_v17  ;;  %v804_v21 = vpop.f32.mrb[1].mxu0  ;;  %v952_v17 = vld [vmem:[#allocation7 + $0xe0] sm:$0xff] }
 0x1f5   : > { %v3392_v25 = vadd.f32 %v804_v21, %v729_v18  ;;  %v954_v18 = vld [vmem:[#allocation7 + $0xf0] sm:$0xff] }
 0x1f6   : > { %v807_v30 = vmax.f32 %v3390_v20, 0.0  ;;  %v2222_v19 = vpack.c.bf16 %v954_v18, %v952_v17  ;;  %v1158_v17 = vld [vmem:[#allocation11 + $0x18] sm:$0xff]  ;;  %v1155_v18 = vld [vmem:[#allocation11] sm:$0xff] }
 0x1f7   : > { %v808_v36 = vmax.f32 %v3392_v25, 0.0  ;;  %v1053_v25 = vld [vmem:[#allocation10] sm:$0xff] }
 0x1f8   : > { %2223 = vmatpush1.bf16.msra.mxu0 %v2222_v19 }
 0x1f9   : > { %v2527_v39 = vpack.i.bf16 %v807_v30, %v808_v36 }
 0x1fb   : > { %2528 = vrot.lane.b32.xlu0 %v2527_v39, %s2866_s18  ;;  %v1058_v39 = vld [vmem:[#allocation10 + $0x28] sm:$0xff] }
 0x1fc   : > { %v2234_v42 = vpack.c.bf16 %v1058_v39, %v1057_v38  ;;  %v1170_v38 = vld [vmem:[#allocation11 + $0x78] sm:$0xff] }
 0x26d   : > { %v2529_v5 = vpop.permute.xlu0 %2528 }
 0x26e   : > { %v2531_v6 = vunpack.i.h.bf16 %v2529_v5  ;;  %v2530_v7 = vunpack.i.l.bf16 %v2529_v5  ;;  %v2252_v5 = vpack.c.bf16 %v1084_v4, %v1083_v3 }
 0x270   : > { %v819_v9 = vsel %vm815_vm1, %v2530_v7, 0.0  ;;  %v816_v11 = vsel %vm815_vm1, %v2531_v6, %v2530_v7  ;;  %v1067_v6 = vld [vmem:[#allocation10 + $0x70] sm:$0xff]  ;;  %v1068_v7 = vld [vmem:[#allocation10 + $0x78] sm:$0xff] }
 0x271   : > { %v821_v12 = vmax.f32 %v808_v36, %v819_v9  ;;  %v820_v13 = vmax.f32 %v807_v30, %v816_v11  ;;  %v2226_v30 = vpack.c.bf16 %v1054_v27, %v1053_v25  ;;  %v2230_v36 = vpack.c.bf16 %v1056_v33, %v1055_v32  ;;  %v1159_v27 = vld [vmem:[#allocation11 + $0x20] sm:$0xff] }
 0x272   : > { %v2254_v9 = vpack.c.bf16 %v1068_v7, %v1067_v6  ;;  %v961_v11 = vrot.slane %v956_v2, %v3369_v8  ;;  %v2262_v32 = vpack.c.bf16 %v1161_v28, %v1159_v27  ;;  %v1184_v6 = vld [vmem:[#allocation11 + $0xe8] sm:$0xff]  ;;  %v1186_v7 = vld [vmem:[#allocation11 + $0xf8] sm:$0xff] }
 0x273   : > { %918 = vmatprep.mubr.f32.mxu1 %v821_v12  ;;  %v965_v12 = vrot.slane %v956_v2, %v3374_v10  ;;  %v1287_v27 = vld [vmem:[%s3731_s17 + $0x18] sm:$0xff]  ;;  %v1304_v28 = vld [vmem:[%s3731_s17 + $0xa0] sm:$0xff] }
 0x274   : > { %919 = vmatmul.mubr.f32.vlgmr.msra.gmra.mrb[0].mxu1 %v820_v13 }
 0x275   : > { %2227 = vmatpush3.bf16.msra.mxu1 %v2226_v30 }
 0x276   : > { %2229 = vmatprep.subr.bf16.mxu1 %v2228_v31  ;;  %v1166_v31 = vld [vmem:[#allocation11 + $0x58] sm:$0xff] }
 0x277   : > { %v2264_v34 = vpack.c.bf16 %v1166_v31, %v1164_v29  ;;  %v1305_v29 = vld [vmem:[%s3731_s17 + $0xa8] sm:$0xff] }
 0x278   : > { %v2296_v31 = vpack.c.bf16 %v1305_v29, %v1304_v28  ;;  %v1394_v29 = vld [vmem:[#allocation14 + $0x40] sm:$0xff] }
 0x279   : > { %2231 = vmatpush3.bf16.msra.mxu1 %v2230_v36  ;;  %v1165_v36 = vld [vmem:[#allocation11 + $0x50] sm:$0xff] }
 0x27a   : > { %2233 = vmatprep.subr.bf16.mxu1 %v2232_v37  ;;  %v1168_v37 = vld [vmem:[#allocation11 + $0x68] sm:$0xff]  ;;  %v2266_v39 = vpack.c.bf16 %v1165_v36, %v1163_v35 }
 0x27b   : > { %v2268_v40 = vpack.c.bf16 %v1170_v38, %v1168_v37  ;;  %v1307_v35 = vld [vmem:[%s3731_s17 + $0xb8] sm:$0xff]  ;;  %v1290_v38 = vld [vmem:[%s3731_s17 + $0x30] sm:$0xff] }
 0x27d   : > { %2235 = vmatpush3.bf16.msra.mxu1 %v2234_v42  ;;  %v1169_v42 = vld [vmem:[#allocation11 + $0x70] sm:$0xff] }
 0x27e   : > { %2237 = vmatprep.subr.bf16.mxu1 %v2236_v43  ;;  %v1172_v43 = vld [vmem:[#allocation11 + $0x88] sm:$0xff]  ;;  %v2270_v45 = vpack.c.bf16 %v1169_v42, %v1167_v41  ;;  %v1309_v41 = vld [vmem:[%s3731_s17 + $0xc8] sm:$0xff] }
 0x27f   : > { %v2272_v46 = vpack.c.bf16 %v1174_v44, %v1172_v43  ;;  %v1292_v44 = vld [vmem:[%s3731_s17 + $0x40] sm:$0xff] }
 0x281   : > { %2239 = vmatpush3.bf16.msra.mxu1 %v2238_v48  ;;  %v1173_v48 = vld [vmem:[#allocation11 + $0x90] sm:$0xff] }
 0x282   : > { %2241 = vmatprep.subr.bf16.mxu1 %v2240_v49  ;;  %v1176_v49 = vld [vmem:[#allocation11 + $0xa8] sm:$0xff]  ;;  %v2274_v51 = vpack.c.bf16 %v1173_v48, %v1171_v47 }
 0x283   : > { %v2276_v52 = vpack.c.bf16 %v1178_v50, %v1176_v49  ;;  %v1311_v47 = vld [vmem:[%s3731_s17 + $0xd8] sm:$0xff]  ;;  %v1294_v50 = vld [vmem:[%s3731_s17 + $0x50] sm:$0xff] }
 0x285   : > { %2243 = vmatpush3.bf16.msra.mxu1 %v2242_v54  ;;  %v1177_v54 = vld [vmem:[#allocation11 + $0xb0] sm:$0xff] }
 0x286   : > { %2245 = vmatprep.subr.bf16.mxu1 %v2244_v55  ;;  %v1180_v55 = vld [vmem:[#allocation11 + $0xc8] sm:$0xff]  ;;  %v2278_v57 = vpack.c.bf16 %v1177_v54, %v1175_v53  ;;  %v1313_v53 = vld [vmem:[%s3731_s17 + $0xe8] sm:$0xff] }
 0x287   : > { %v2280_v58 = vpack.c.bf16 %v1182_v56, %v1180_v55  ;;  %v1296_v56 = vld [vmem:[%s3731_s17 + $0x60] sm:$0xff] }
 0x289   : > { %2247 = vmatpush3.bf16.msra.mxu1 %v2246_v60  ;;  %v1181_v60 = vld [vmem:[#allocation11 + $0xd0] sm:$0xff] }
 0x28a   : > { %2249 = vmatprep.subr.bf16.mxu1 %v2248_v61  ;;  %v2282_v61 = vpack.c.bf16 %v1181_v60, %v1179_v59  ;;  %v1187_v59 = vld [vmem:[#allocation13] sm:$0x3] }
 0x28b   : > { %v1314_v60 = vld [vmem:[%s3731_s17 + $0xf0] sm:$0xff] }
 0x28d   : > { %2251 = vmatpush3.bf16.msra.mxu1 %v2250_v0 }
 0x28e   : > { %2253 = vmatprep.subr.bf16.mxu1 %v2252_v5 }
 0x291   : > { %2255 = vmatpush3.bf16.msra.mxu1 %v2254_v9  ;;  %v2284_v9 = vpack.c.bf16 %v1186_v7, %v1184_v6 }
 0x347   : > { %v1998_v20 = vpop.f32.mrb[0].mxu1 }
 0x348   : > { %v1999_v21 = vpop.f32.mrb[1].mxu1 }
 0x349   : > { %v2000_v22 = vadd.f32 %v1999_v21, %v1998_v20  ;;  %v2256_v20 = vpack.c.bf16 %v1158_v17, %v1156_v16  ;;  %v1157_v21 = vld [vmem:[#allocation11 + $0x10] sm:$0xff] }
 0x34a   : > { %v2258_v25 = vpack.c.bf16 %v1157_v21, %v1155_v18  ;;  %v1300_v17 = vld [vmem:[%s3731_s17 + $0x80] sm:$0xff]  ;;  %v1301_v18 = vld [vmem:[%s3731_s17 + $0x88] sm:$0xff] }
 0x34b   : > { %1033 = vmatmul.mubr.f32.vlgmr.msra.gmra.mrb[2].mxu0 %v2000_v22  ;;  %v1160_v22 = vld [vmem:[#allocation11 + $0x28] sm:$0xff]  ;;  %2257 = vmatprep.subr.bf16.mxu0 %v2256_v20  ;;  %v2288_v20 = vpack.c.bf16 %v1301_v18, %v1300_v17  ;;  %v1285_v21 = vld [vmem:[%s3731_s17 + $0x8] sm:$0xff] }
 0x34c   : > { %1263 = vmatprep.mubr.f32.mxu0 %v2865_v1  ;;  %v2260_v26 = vpack.c.bf16 %v1162_v23, %v1160_v22  ;;  %2259 = vmatpush1.bf16.msra.mxu0 %v2258_v25  ;;  %v1302_v22 = vld [vmem:[%s3731_s17 + $0x90] sm:$0xff]  ;;  %v1303_v23 = vld [vmem:[%s3731_s17 + $0x98] sm:$0xff] }
 0x34d   : > { %v2292_v25 = vpack.c.bf16 %v1303_v23, %v1302_v22  ;;  %2289 = vmatprep.subr.bf16.mxu1 %v2288_v20  ;;  %v1393_v17 = vld [vmem:[#allocation14 + $0x38] sm:$0xff]  ;;  %v1392_v22 = vld [vmem:[#allocation14 + $0x30] sm:$0xff]  ;;  %v1395_v23 = vld [vmem:[#allocation14 + $0x48] sm:$0xff] }
 0x34e   : > { %2261 = vmatprep.subr.bf16.mxu0 %v2260_v26  ;;  %v1286_v26 = vld [vmem:[%s3731_s17 + $0x10] sm:$0xff] }
 0x350   : > { %2263 = vmatpush1.bf16.msra.mxu0 %v2262_v32  ;;  %v1288_v32 = vld [vmem:[%s3731_s17 + $0x20] sm:$0xff] }
 0x351   : > { %2265 = vmatprep.subr.bf16.mxu0 %v2264_v34  ;;  %v1306_v34 = vld [vmem:[%s3731_s17 + $0xb0] sm:$0xff] }
 0x352   : > { %v2300_v37 = vpack.c.bf16 %v1307_v35, %v1306_v34  ;;  %v1398_v35 = vld [vmem:[#allocation14 + $0x60] sm:$0xff] }
 0x354   : > { %2267 = vmatpush1.bf16.msra.mxu0 %v2266_v39  ;;  %v1291_v39 = vld [vmem:[%s3731_s17 + $0x38] sm:$0xff] }
 0x355   : > { %2269 = vmatprep.subr.bf16.mxu0 %v2268_v40  ;;  %v1308_v40 = vld [vmem:[%s3731_s17 + $0xc0] sm:$0xff]  ;;  %v2302_v42 = vpack.c.bf16 %v1291_v39, %v1290_v38  ;;  %v1405_v38 = vld [vmem:[#allocation14 + $0x98] sm:$0xff] }
 0x356   : > { %v2304_v43 = vpack.c.bf16 %v1309_v41, %v1308_v40  ;;  %v1402_v41 = vld [vmem:[#allocation14 + $0x80] sm:$0xff] }
 0x358   : > { %2271 = vmatpush1.bf16.msra.mxu0 %v2270_v45  ;;  %v1293_v45 = vld [vmem:[%s3731_s17 + $0x48] sm:$0xff] }
 0x359   : > { %2273 = vmatprep.subr.bf16.mxu0 %v2272_v46  ;;  %v1310_v46 = vld [vmem:[%s3731_s17 + $0xd0] sm:$0xff]  ;;  %v2306_v48 = vpack.c.bf16 %v1293_v45, %v1292_v44 }
 0x35a   : > { %v2308_v49 = vpack.c.bf16 %v1311_v47, %v1310_v46  ;;  %v1409_v44 = vld [vmem:[#allocation14 + $0xb8] sm:$0xff]  ;;  %v1406_v47 = vld [vmem:[#allocation14 + $0xa0] sm:$0xff] }
 0x35c   : > { %2275 = vmatpush1.bf16.msra.mxu0 %v2274_v51  ;;  %v1295_v51 = vld [vmem:[%s3731_s17 + $0x58] sm:$0xff] }
 0x35d   : > { %2277 = vmatprep.subr.bf16.mxu0 %v2276_v52  ;;  %v1312_v52 = vld [vmem:[%s3731_s17 + $0xe0] sm:$0xff]  ;;  %v2310_v54 = vpack.c.bf16 %v1295_v51, %v1294_v50  ;;  %v1413_v50 = vld [vmem:[#allocation14 + $0xd8] sm:$0xff] }
 0x35e   : > { %v2312_v55 = vpack.c.bf16 %v1313_v53, %v1312_v52  ;;  %v1410_v53 = vld [vmem:[#allocation14 + $0xc0] sm:$0xff] }
 0x360   : > { %2279 = vmatpush1.bf16.msra.mxu0 %v2278_v57  ;;  %v1297_v57 = vld [vmem:[%s3731_s17 + $0x68] sm:$0xff] }
 0x361   : > { %2281 = vmatprep.subr.bf16.mxu0 %v2280_v58  ;;  %v2314_v58 = vpack.c.bf16 %v1297_v57, %v1296_v56 }
 0x364   : > { %2283 = vmatpush1.bf16.msra.mxu0 %v2282_v61  ;;  %v1315_v61 = vld [vmem:[%s3731_s17 + $0xf8] sm:$0xff] }
 0x365   : > { %2285 = vmatprep.subr.bf16.mxu0 %v2284_v9  ;;  %v1387_v9 = vld [vmem:[#allocation14 + $0x8] sm:$0xff] }
 0x41e   : > { %v1034_v13 = vpop.f32.mrb[2].mxu0 }
 0x41f   : > { %v3402_v14 = vadd.f32 %v1034_v13, %v961_v11  ;;  %v1036_v15 = vpop.f32.mrb[3].mxu0  ;;  %v1183_v11 = vld [vmem:[#allocation11 + $0xe0] sm:$0xff] }
 0x420   : > { %v3404_v19 = vadd.f32 %v1036_v15, %v965_v12  ;;  %v1185_v12 = vld [vmem:[#allocation11 + $0xf0] sm:$0xff] }
 0x421   : > { %v1039_v24 = vmax.f32 %v3402_v14, 0.0  ;;  %v2286_v13 = vpack.c.bf16 %v1185_v12, %v1183_v11  ;;  %v1389_v11 = vld [vmem:[#allocation14 + $0x18] sm:$0xff]  ;;  %v1386_v12 = vld [vmem:[#allocation14] sm:$0xff] }
 0x422   : > { %v1040_v30 = vmax.f32 %v3404_v19, 0.0  ;;  %v1284_v19 = vld [vmem:[%s3731_s17] sm:$0xff] }
 0x423   : > { %2287 = vmatpush1.bf16.msra.mxu0 %v2286_v13 }
 0x424   : > { %v2532_v33 = vpack.i.bf16 %v1039_v24, %v1040_v30 }
 0x426   : > { %2533 = vrot.lane.b32.xlu0 %v2532_v33, %s2866_s18  ;;  %v1289_v33 = vld [vmem:[%s3731_s17 + $0x28] sm:$0xff] }
 0x427   : > { %v2298_v36 = vpack.c.bf16 %v1289_v33, %v1288_v32  ;;  %v1401_v32 = vld [vmem:[#allocation14 + $0x78] sm:$0xff] }
 0x498   : > { %v2534_v62 = vpop.permute.xlu0 %2533 }
 0x499   : > { %v2536_v63 = vunpack.i.h.bf16 %v2534_v62  ;;  %v2535_v0 = vunpack.i.l.bf16 %v2534_v62  ;;  %v2316_v62 = vpack.c.bf16 %v1315_v61, %v1314_v60 }
 0x49b   : > { %v1047_v2 = vsel %vm815_vm1, %v2536_v63, %v2535_v0  ;;  %v1050_v3 = vsel %vm815_vm1, %v2535_v0, 0.0  ;;  %v1298_v63 = vld [vmem:[%s3731_s17 + $0x70] sm:$0xff]  ;;  %v1299_v0 = vld [vmem:[%s3731_s17 + $0x78] sm:$0xff] }
 0x49c   : > { %v1051_v4 = vmax.f32 %v1039_v24, %v1047_v2  ;;  %v1052_v5 = vmax.f32 %v1040_v30, %v1050_v3  ;;  %v2290_v24 = vpack.c.bf16 %v1285_v21, %v1284_v19  ;;  %v2294_v30 = vpack.c.bf16 %v1287_v27, %v1286_v26  ;;  %v1390_v21 = vld [vmem:[#allocation14 + $0x20] sm:$0xff] }
 0x49d   : > { %v2318_v2 = vpack.c.bf16 %v1299_v0, %v1298_v63  ;;  %v1192_v3 = vrot.slane %v1187_v59, %v3369_v8  ;;  %v2326_v26 = vpack.c.bf16 %v1392_v22, %v1390_v21  ;;  %v1415_v63 = vld [vmem:[#allocation14 + $0xe8] sm:$0xff]  ;;  %v1417_v0 = vld [vmem:[#allocation14 + $0xf8] sm:$0xff] }
 0x49e   : > { %1149 = vmatprep.mubr.f32.mxu1 %v1052_v5 }
 0x49f   : > { %1150 = vmatmul.mubr.f32.vlgmr.msra.gmra.mrb[2].mxu1 %v1051_v4  ;;  %v1196_v4 = vrot.slane %v1187_v59, %v3374_v10 }
 0x4a0   : > { %2291 = vmatpush3.bf16.msra.mxu1 %v2290_v24 }
 0x4a1   : > { %2293 = vmatprep.subr.bf16.mxu1 %v2292_v25  ;;  %v1397_v25 = vld [vmem:[#allocation14 + $0x58] sm:$0xff] }
 0x4a2   : > { %v2328_v28 = vpack.c.bf16 %v1397_v25, %v1395_v23  ;;  %v1507_v23 = vld [vmem:[%s3732_s23 + $0x20] sm:$0xff]  ;;  %v1525_v25 = vld [vmem:[%s3732_s23 + $0xb0] sm:$0xff] }
 0x4a4   : > { %2295 = vmatpush3.bf16.msra.mxu1 %v2294_v30  ;;  %v1396_v30 = vld [vmem:[#allocation14 + $0x50] sm:$0xff] }
 0x4a5   : > { %2297 = vmatprep.subr.bf16.mxu1 %v2296_v31  ;;  %v1399_v31 = vld [vmem:[#allocation14 + $0x68] sm:$0xff]  ;;  %v2330_v33 = vpack.c.bf16 %v1396_v30, %v1394_v29  ;;  %v1509_v29 = vld [vmem:[%s3732_s23 + $0x30] sm:$0xff] }
 0x4a6   : > { %v2332_v34 = vpack.c.bf16 %v1401_v32, %v1399_v31  ;;  %v1510_v30 = vld [vmem:[%s3732_s23 + $0x38] sm:$0xff]  ;;  %v1527_v31 = vld [vmem:[%s3732_s23 + $0xc0] sm:$0xff]  ;;  %v1528_v32 = vld [vmem:[%s3732_s23 + $0xc8] sm:$0xff] }
 0x4a8   : > { %2299 = vmatpush3.bf16.msra.mxu1 %v2298_v36  ;;  %v1400_v36 = vld [vmem:[#allocation14 + $0x70] sm:$0xff] }
 0x4a9   : > { %2301 = vmatprep.subr.bf16.mxu1 %v2300_v37  ;;  %v1403_v37 = vld [vmem:[#allocation14 + $0x88] sm:$0xff]  ;;  %v2334_v39 = vpack.c.bf16 %v1400_v36, %v1398_v35  ;;  %v1512_v36 = vld [vmem:[%s3732_s23 + $0x48] sm:$0xff] }
 0x4aa   : > { %v2336_v40 = vpack.c.bf16 %v1405_v38, %v1403_v37  ;;  %v1511_v35 = vld [vmem:[%s3732_s23 + $0x40] sm:$0xff]  ;;  %v1529_v37 = vld [vmem:[%s3732_s23 + $0xd0] sm:$0xff]  ;;  %v1530_v38 = vld [vmem:[%s3732_s23 + $0xd8] sm:$0xff] }
 0x4ac   : > { %2303 = vmatpush3.bf16.msra.mxu1 %v2302_v42  ;;  %v1404_v42 = vld [vmem:[#allocation14 + $0x90] sm:$0xff] }
 0x4ad   : > { %2305 = vmatprep.subr.bf16.mxu1 %v2304_v43  ;;  %v1407_v43 = vld [vmem:[#allocation14 + $0xa8] sm:$0xff]  ;;  %v2338_v45 = vpack.c.bf16 %v1404_v42, %v1402_v41  ;;  %v1513_v41 = vld [vmem:[%s3732_s23 + $0x50] sm:$0xff] }
 0x4ae   : > { %v2340_v46 = vpack.c.bf16 %v1409_v44, %v1407_v43  ;;  %v1514_v42 = vld [vmem:[%s3732_s23 + $0x58] sm:$0xff]  ;;  %v1531_v43 = vld [vmem:[%s3732_s23 + $0xe0] sm:$0xff]  ;;  %v1532_v44 = vld [vmem:[%s3732_s23 + $0xe8] sm:$0xff] }
 0x4b0   : > { %2307 = vmatpush3.bf16.msra.mxu1 %v2306_v48  ;;  %v1408_v48 = vld [vmem:[#allocation14 + $0xb0] sm:$0xff] }
 0x4b1   : > { %2309 = vmatprep.subr.bf16.mxu1 %v2308_v49  ;;  %v1411_v49 = vld [vmem:[#allocation14 + $0xc8] sm:$0xff]  ;;  %v2342_v51 = vpack.c.bf16 %v1408_v48, %v1406_v47 }
 0x4b2   : > { %v2344_v52 = vpack.c.bf16 %v1413_v50, %v1411_v49  ;;  %v1515_v50 = vld [vmem:[%s3732_s23 + $0x60] sm:$0xff] }
 0x4b4   : > { %2311 = vmatpush3.bf16.msra.mxu1 %v2310_v54  ;;  %v1412_v54 = vld [vmem:[#allocation14 + $0xd0] sm:$0xff] }
 0x4b5   : > { %2313 = vmatprep.subr.bf16.mxu1 %v2312_v55  ;;  %v2346_v55 = vpack.c.bf16 %v1412_v54, %v1410_v53  ;;  %v1533_v53 = vld [vmem:[%s3732_s23 + $0xf0] sm:$0xff]  ;;  %v1534_v54 = vld [vmem:[%s3732_s23 + $0xf8] sm:$0xff] }
 0x4b8   : > { %2315 = vmatpush3.bf16.msra.mxu1 %v2314_v58 }
 0x4b9   : > { %2317 = vmatprep.subr.bf16.mxu1 %v2316_v62 }
 0x4bc   : > { %2319 = vmatpush3.bf16.msra.mxu1 %v2318_v2  ;;  %v2348_v2 = vpack.c.bf16 %v1417_v0, %v1415_v63  ;;  %v1616_v0 = vld [vmem:[%s3733_s25 + $0x18] sm:$0xff] }
 0x572   : > { %v2033_v14 = vpop.f32.mrb[2].mxu1 }
 0x573   : > { %v2034_v15 = vpop.f32.mrb[3].mxu1 }
 0x574   : > { %v2035_v16 = vadd.f32 %v2034_v15, %v2033_v14  ;;  %v2320_v14 = vpack.c.bf16 %v1389_v11, %v1387_v9  ;;  %v1388_v15 = vld [vmem:[#allocation14 + $0x10] sm:$0xff] }
 0x575   : > { %v2322_v19 = vpack.c.bf16 %v1388_v15, %v1386_v12  ;;  %v1503_v9 = vld [vmem:[%s3732_s23] sm:$0xff]  ;;  %v1504_v12 = vld [vmem:[%s3732_s23 + $0x8] sm:$0xff] }
 0x576   : > { %1264 = vmatmul.mubr.f32.vlgmr.msra.gmra.mrb[4].mxu0 %v2035_v16  ;;  %v1391_v16 = vld [vmem:[#allocation14 + $0x28] sm:$0xff]  ;;  %2321 = vmatprep.subr.bf16.mxu0 %v2320_v14  ;;  %v2354_v15 = vpack.c.bf16 %v1504_v12, %v1503_v9 }
 0x577   : > { %1494 = vmatprep.mubr.f32.mxu0 %v2865_v1  ;;  %v2324_v20 = vpack.c.bf16 %v1393_v17, %v1391_v16  ;;  %2323 = vmatpush1.bf16.msra.mxu0 %v2322_v19  ;;  %v1522_v14 = vld [vmem:[%s3732_s23 + $0x98] sm:$0xff]  ;;  %v1505_v17 = vld [vmem:[%s3732_s23 + $0x10] sm:$0xff]  ;;  %v1523_v19 = vld [vmem:[%s3732_s23 + $0xa0] sm:$0xff] }
 0x579   : > { %2325 = vmatprep.subr.bf16.mxu0 %v2324_v20  ;;  %v1524_v20 = vld [vmem:[%s3732_s23 + $0xa8] sm:$0xff] }
 0x57a   : > { %v2360_v22 = vpack.c.bf16 %v1524_v20, %v1523_v19  ;;  %v1959_v19 = vld [vmem:[%s3734_s5] ss:$0 sm:$0xff] }
 0x57b   : > { %2327 = vmatpush1.bf16.msra.mxu0 %v2326_v26  ;;  %v1526_v26 = vld [vmem:[%s3732_s23 + $0xb8] sm:$0xff] }
 0x57c   : > { %2329 = vmatprep.subr.bf16.mxu0 %v2328_v28  ;;  %v2364_v28 = vpack.c.bf16 %v1526_v26, %v1525_v25  ;;  %v1703_v25 = vld [vmem:[%s3735_s26 + $0x8] sm:$0xff] }
 0x57f   : > { %2331 = vmatpush1.bf16.msra.mxu0 %v2330_v33  ;;  %v2366_v33 = vpack.c.bf16 %v1510_v30, %v1509_v29 }
 0x580   : > { %2333 = vmatprep.subr.bf16.mxu0 %v2332_v34  ;;  %v2368_v34 = vpack.c.bf16 %v1528_v32, %v1527_v31  ;;  %v1962_v31 = vld [vmem:[#allocation2] ss:$0 sm:$0xff] }
 0x583   : > { %2335 = vmatpush1.bf16.msra.mxu0 %v2334_v39  ;;  %v2370_v39 = vpack.c.bf16 %v1512_v36, %v1511_v35 }
 0x584   : > { %2337 = vmatprep.subr.bf16.mxu0 %v2336_v40  ;;  %v2372_v40 = vpack.c.bf16 %v1530_v38, %v1529_v37 }
 0x587   : > { %2339 = vmatpush1.bf16.msra.mxu0 %v2338_v45  ;;  %v2374_v45 = vpack.c.bf16 %v1514_v42, %v1513_v41 }
 0x588   : > { %2341 = vmatprep.subr.bf16.mxu0 %v2340_v46  ;;  %v2376_v46 = vpack.c.bf16 %v1532_v44, %v1531_v43 }
 0x58b   : > { %2343 = vmatpush1.bf16.msra.mxu0 %v2342_v51  ;;  %v1516_v51 = vld [vmem:[%s3732_s23 + $0x68] sm:$0xff] }
 0x58c   : > { %2345 = vmatprep.subr.bf16.mxu0 %v2344_v52  ;;  %v2378_v52 = vpack.c.bf16 %v1516_v51, %v1515_v50 }
 0x58f   : > { %2347 = vmatpush1.bf16.msra.mxu0 %v2346_v55  ;;  %v2380_v55 = vpack.c.bf16 %v1534_v54, %v1533_v53 }
 0x590   : > { %2349 = vmatprep.subr.bf16.mxu0 %v2348_v2 }
 0x649   : > { %v1265_v5 = vpop.f32.mrb[4].mxu0 }
 0x64a   : > { %v3510_v6 = vadd.f32 %v1265_v5, %v1192_v3  ;;  %v1267_v7 = vpop.f32.mrb[5].mxu0  ;;  %v1414_v3 = vld [vmem:[#allocation14 + $0xe0] sm:$0xff] }
 0x64b   : > { %v3512_v13 = vadd.f32 %v1267_v7, %v1196_v4  ;;  %v1416_v4 = vld [vmem:[#allocation14 + $0xf0] sm:$0xff] }
 0x64c   : > { %v1270_v18 = vmax.f32 %v3510_v6, 0.0  ;;  %v2350_v5 = vpack.c.bf16 %v1416_v4, %v1414_v3  ;;  %v1519_v6 = vld [vmem:[%s3732_s23 + $0x80] sm:$0xff]  ;;  %v1520_v7 = vld [vmem:[%s3732_s23 + $0x88] sm:$0xff]  ;;  %v1418_v3 = vld [vmem:[#allocation16] sm:$0x3] }
 0x64d   : > { %v1271_v24 = vmax.f32 %v3512_v13, 0.0  ;;  %v2352_v11 = vpack.c.bf16 %v1520_v7, %v1519_v6  ;;  %v1521_v13 = vld [vmem:[%s3732_s23 + $0x90] sm:$0xff]  ;;  %v1423_v4 = vrot.slane %v1418_v3, %v3369_v8 }
 0x64e   : > { %2351 = vmatpush1.bf16.msra.mxu0 %v2350_v5  ;;  %v2356_v16 = vpack.c.bf16 %v1522_v14, %v1521_v13  ;;  %v1427_v5 = vrot.slane %v1418_v3, %v3374_v10  ;;  %v1617_v14 = vld [vmem:[%s3733_s25 + $0x20] sm:$0xff]  ;;  %v1619_v8 = vld [vmem:[%s3733_s25 + $0x30] sm:$0xff]  ;;  %v1620_v10 = vld [vmem:[%s3733_s25 + $0x38] sm:$0xff] }
 0x64f   : > { %v2537_v27 = vpack.i.bf16 %v1270_v18, %v1271_v24  ;;  %2353 = vmatprep.subr.bf16.mxu1 %v2352_v11 }
 0x651   : > { %2538 = vrot.lane.b32.xlu1 %v2537_v27, %s2866_s18 }
 0x6c3   : > { %v2539_v56 = vpop.permute.xlu1 %2538 }
 0x6c4   : > { %v2541_v57 = vunpack.i.h.bf16 %v2539_v56  ;;  %v2540_v58 = vunpack.i.l.bf16 %v2539_v56  ;;  %v1517_v56 = vld [vmem:[%s3732_s23 + $0x70] sm:$0xff] }
 0x6c6   : > { %v1278_v59 = vsel %vm815_vm1, %v2541_v57, %v2540_v58  ;;  %v1281_v60 = vsel %vm815_vm1, %v2540_v58, 0.0  ;;  %v1518_v57 = vld [vmem:[%s3732_s23 + $0x78] sm:$0xff] }
 0x6c7   : > { %v1282_v61 = vmax.f32 %v1270_v18, %v1278_v59  ;;  %v1283_v62 = vmax.f32 %v1271_v24, %v1281_v60  ;;  %v1506_v18 = vld [vmem:[%s3732_s23 + $0x18] sm:$0xff]  ;;  %v1508_v24 = vld [vmem:[%s3732_s23 + $0x28] sm:$0xff]  ;;  %v2382_v58 = vpack.c.bf16 %v1518_v57, %v1517_v56  ;;  %v1613_v59 = vld [vmem:[%s3733_s25] sm:$0xff] }
 0x6c8   : > { %v2358_v21 = vpack.c.bf16 %v1506_v18, %v1505_v17  ;;  %v2362_v27 = vpack.c.bf16 %v1508_v24, %v1507_v23  ;;  %v1614_v60 = vld [vmem:[%s3733_s25 + $0x8] sm:$0xff]  ;;  %v2394_v17 = vpack.c.bf16 %v1620_v10, %v1619_v8  ;;  %v1702_v24 = vld [vmem:[%s3735_s26] sm:$0xff] }
 0x6c9   : > { %1380 = vmatprep.mubr.f32.mxu1 %v1283_v62  ;;  %v2867_v62 = vmov 0.0|0.0   ;;  %v2385_v63 = vpack.c.bf16 %v1614_v60, %v1613_v59  ;;  %v2397_v26 = vpack.c.bf16 %v1703_v25, %v1702_v24 }
 0x6ca   : > { %1381 = vmatmul.mubr.f32.vlgmr.msra.gmra.mrb[4].mxu1 %v1282_v61  ;;  %v1615_v61 = vld [vmem:[%s3733_s25 + $0x10] sm:$0xff]  ;;  %2384 = vmatprep.subr.bf16.mxu0 %v2867_v62 }
 0x6cb   : > { %2355 = vmatpush3.bf16.msra.mxu1 %v2354_v15  ;;  %v2388_v2 = vpack.c.bf16 %v1616_v0, %v1615_v61  ;;  %v1618_v15 = vld [vmem:[%s3733_s25 + $0x28] sm:$0xff] }
 0x6cc   : > { %2357 = vmatprep.subr.bf16.mxu1 %v2356_v16  ;;  %v2391_v16 = vpack.c.bf16 %v1618_v15, %v1617_v14 }
 0x6cf   : > { %2359 = vmatpush3.bf16.msra.mxu1 %v2358_v21 }
 0x6d0   : > { %2361 = vmatprep.subr.bf16.mxu1 %v2360_v22 }
 0x6d3   : > { %2363 = vmatpush3.bf16.msra.mxu1 %v2362_v27  ;;  %v1960_v27 = vld [vmem:[%s3736_s9] ss:$0 sm:$0xff] }
 0x6d4   : > { %2365 = vmatprep.subr.bf16.mxu1 %v2364_v28 }
 0x6d7   : > { %2367 = vmatpush3.bf16.msra.mxu1 %v2366_v33 }
 0x6d8   : > { %2369 = vmatprep.subr.bf16.mxu1 %v2368_v34 }
 0x6db   : > { %2371 = vmatpush3.bf16.msra.mxu1 %v2370_v39 }
 0x6dc   : > { %2373 = vmatprep.subr.bf16.mxu1 %v2372_v40 }
 0x6df   : > { %2375 = vmatpush3.bf16.msra.mxu1 %v2374_v45 }
 0x6e0   : > { %2377 = vmatprep.subr.bf16.mxu1 %v2376_v46 }
 0x6e3   : > { %2379 = vmatpush3.bf16.msra.mxu1 %v2378_v52 }
 0x6e4   : > { %2381 = vmatprep.subr.bf16.mxu1 %v2380_v55 }
 0x6e7   : > { %2383 = vmatpush3.bf16.msra.mxu1 %v2382_v58 }
 0x79d   : > { %v2068_v47 = vpop.f32.mrb[4].mxu1 }
 0x79e   : > { %v2069_v48 = vpop.f32.mrb[5].mxu1 }
 0x79f   : > { %v2070_v49 = vadd.f32 %v2069_v48, %v2068_v47 }
 0x7a1   : > { %1495 = vmatmul.mubr.f32.vlgmr.msra.gmra.mrb[6].mxu0 %v2070_v49 }
 0x7a2   : > { %2386 = vmatpush3.bf16.msra.mxu0 %v2385_v63  ;;  %2134 = vmatprep.mubr.msk.f32.mxu0 %vm2868_vm2, %v2865_v1 }
 0x7a3   : > { %2387 = vmatprep.subr.bf16.mxu0 %v2867_v62 }
 0x7a6   : > { %2389 = vmatpush3.bf16.msra.mxu0 %v2388_v2 }
 0x7a7   : > { %2390 = vmatprep.subr.bf16.mxu0 %v2867_v62 }
 0x7aa   : > { %2392 = vmatpush3.bf16.msra.mxu0 %v2391_v16 }
 0x7ab   : > { %2393 = vmatprep.subr.bf16.mxu0 %v2867_v62 }
 0x7ae   : > { %2395 = vmatpush3.bf16.msra.mxu0 %v2394_v17 }
 0x7af   : > { %2396 = vmatprep.subr.bf16.mxu0 %v2867_v62 }
 0x874   : > { %v1496_v6 = vpop.f32.mrb[6].mxu0 }
 0x875   : > { %v1497_v7 = vadd.f32 %v1496_v6, %v1423_v4  ;;  %v1498_v9 = vpop.f32.mrb[7].mxu0 }
 0x876   : > { %v1499_v11 = vadd.f32 %v1498_v9, %v1427_v5 }
 0x877   : > { %v1501_v13 = vmax.f32 %v1497_v7, 0.0 }
 0x878   : > { %v1502_v12 = vmax.f32 %v1499_v11, 0.0 }
 0x87a   : > { %1606 = vmatprep.mubr.f32.mxu1 %v1502_v12 }
 0x87b   : > { %1607 = vmatmul.mubr.f32.vlgmr.msra.gmra.mrb[6].mxu1 %v1501_v13 }
 0x94e   : > { %v2103_v18 = vpop.f32.mrb[6].mxu1 }
 0x94f   : > { %v2104_v20 = vpop.f32.mrb[7].mxu1 }
 0x950   : > { %v2105_v21 = vadd.f32 %v2104_v20, %v2103_v18 }
 0x952   : > { %v1609_v22 = vadd.f32 %v2105_v21, %v1959_v19 }
 0x954   : > { %v1612_v23 = vmax.f32 %v1609_v22, 0.0 }
 0x956   : > { %2135 = vmatmul.mubr.msk.f32.vlgmr.msra.gmra.mrb[8].mxu0 %vm732_vm0, %v1612_v23 }
 0x957   : > { %2141 = vmatprep.mubr.msk.f32.mxu0 %vm2868_vm2, %v2865_v1  ;;  %2398 = vmatpush3.bf16.msra.mxu0 %v2397_v26 }
 0xa29   : > { %v1697_v28 = vpop.f32.mrb[8].mxu0 }
 0xa2a   : > { %v1698_v29 = vadd.f32 %v1960_v27, %v1697_v28  ;;  %v2136_v30 = vpop.f32.mrb[9].mxu0 }
 0xa2c   : > { %v1701_v1 = vmax.f32 %v1698_v29, 0.0 }
 0xa2e   : > { %2142 = vmatmul.mubr.msk.f32.vlgmr.msra.gmra.mrb[10].mxu0 %vm1711_vm3, %v1701_v1 }
 0xb01   : > { %v1781_v32 = vpop.f32.mrb[10].mxu0 }
 0xb02   : > { %v1782_v33 = vadd.f32 %v1962_v31, %v1781_v32  ;;  %v2143_v34 = vpop.f32.mrb[11].mxu0 }
 0xb04   : > { %v1785_v35 = vsub.f32 0.0, %v1782_v33 }
 0xb06   : > { %v1786_v36 = vmul.f32 1.442695, %v1785_v35 }
 0xb08   : > { %2542 = vpow2.f32 %v1786_v36 }
 0xb12   : > { %v2543_v37 = vpop.eup %2542 }
 0xb13   : > { %v1788_v38 = vadd.f32 1.0, %v2543_v37 }
 0xb15   : > { %2544 = vrcp.f32 %v1788_v38 }
 0xb1f   : > { %v2545_v39 = vpop.eup %2544 }
 0xb20   : > { %1792 = vst.msk [vmem:[%s702_s29] sm:$0xff] %vm1791_vm4, %v2545_v39 }
 0xb21 PF: > { %p34_p10 = scmp.ge.s32.totalorder %s3196_s22, 4   ;;  %s3738_s29 = smov %s2842_s30 }
 0xb22   : > { %s3739_s30 = smov %s2846_s0  ;;  %s3740_s0 = smov %s3208_s16 }
 0xb23   : > { %s3741_s19 = smov %s3196_s22  ;;  %36 = sbr.rel (!%p34_p10) target bundleno = 19 (0x13), region = 164 }
 0xb2a   :  { %1812 = vsyncpa [#allocation4], 1 }
 0xb2b   :  { %1814 = vsyncpa [#allocation4 + $0x1], 1 }
 0xb2c   :  { %1815 = vsyncpa [#allocation6], 1 }
 0xb2d   :  { %1816 = vsyncpa [#allocation9], 1 }
 0xb2e   :  { %1817 = vsyncpa [#allocation12], 1 }
 0xb2f   :  { %1818 = vsyncpa [#allocation15], 1 }

</bundles_post_ra>
